<compile_context>
chip_gen: v7x
topology: tpu7x:2x2x1
jax: 0.10.0
libtpu: 0.0.40
codegen_flags: <defaults>
</compile_context>

<pallas_src>
import jax
import jax.numpy as jnp
import numpy as np
from jax.experimental import pallas as pl
from jax.experimental.pallas import tpu as pltpu


# --------------------------------------------------------------------------
# Pallas kernel: fused DecoderBottleneck on a (tm, Cin) tile of flattened input
# --------------------------------------------------------------------------
def decoder_bottleneck_kernel(x_ref,
                              w1_ref, b1_ref,
                              w2_ref, b2_ref,
                              w3_ref,
                              wd_ref, b3d_ref,
                              o_ref):
    C4 = w1_ref.shape[1]

    x = x_ref[...]                                     # (tm, Cin) bf16

    # hoisted single loads of the bias rows (f32); BN scales are pre-folded
    # into the bf16 weights in the wrapper.
    b1 = b1_ref[...]                                   # (1, C4)
    b2 = b2_ref[...]                                   # (1, 4*C4)  pre-tiled
    b3d = b3d_ref[...]                                 # (1, 4*C2)  pre-tiled (b3 + bd)

    # conv1 (1x1) + bn1 + relu                          -> (tm, C4)
    h = jnp.dot(x, w1_ref[...], preferred_element_type=jnp.float32)
    h = jnp.maximum(h + b1, 0.0).astype(jnp.bfloat16)

    # conv2 (ConvTranspose2d k=2 s=2): all 4 quadrants as ONE wide-N matmul
    y = jnp.dot(h, w2_ref[...], preferred_element_type=jnp.float32)   # (tm, 4*C4)
    y = jnp.maximum(y + b2, 0.0).astype(jnp.bfloat16)

    # downsample branch (ConvTranspose2d Cin->C2 k=2 s=2): ONE wide-N matmul
    idn = jnp.dot(x, wd_ref[...], preferred_element_type=jnp.float32)  # (tm, 4*C2)

    # conv3 (1x1) per quadrant on lane-aligned static slices of y (exact FLOPs)
    w3 = w3_ref[...]
    z = jnp.concatenate(
        [jnp.dot(y[:, q * C4:(q + 1) * C4], w3,
                 preferred_element_type=jnp.float32) for q in range(4)],
        axis=-1)                                        # (tm, 4*C2)

    # residual add + merged bias + relu, single lane-dense store
    o_ref[...] = jnp.maximum(z + idn + b3d, 0.0).astype(o_ref.dtype)


# --------------------------------------------------------------------------
# Wrapper
# --------------------------------------------------------------------------
def _pick_tile(M, tm):
    """Largest multiple of 8 that divides M and is <= tm."""
    tm = min(tm, M)
    tm -= tm % 8
    while tm > 8 and M % tm:
        tm -= 8
    return max(tm, 8)


def _fold_pack(p, Cin):
    """Fold BN scales into conv weights and pack ConvTranspose quadrants wide-N."""
    C4, C2 = Cin // 4, Cin // 2
    # scales applied to the *output-channel* (last) axis of each weight
    w1 = (p["w1"] * p["s1"]).astype(jnp.bfloat16)                              # (Cin, C4)
    w2 = jnp.transpose(p["w2q"] * p["s2"], (1, 0, 2)).reshape(
        C4, 4 * C4).astype(jnp.bfloat16)                                       # (C4, 4*C4)
    w3 = (p["w3"] * p["s3"]).astype(jnp.bfloat16)                              # (C4, C2)
    wd = jnp.transpose(p["wdq"] * p["sd"], (1, 0, 2)).reshape(
        Cin, 4 * C2).astype(jnp.bfloat16)                                      # (Cin, 4*C2)
    b1 = p["b1"]                                                               # (1, C4)
    b2 = jnp.tile(p["b2"], (1, 4))                                             # (1, 4*C4)
    b3d = jnp.tile(p["b3"] + p["bd"], (1, 4))                                  # (1, 4*C2)
    return w1, b1, w2, b2, w3, wd, b3d


def decoder_bottleneck(x_nchw, p, *, tm=256):
    B, Cin, H, W = x_nchw.shape
    assert Cin % 4 == 0
    C4, C2 = Cin // 4, Cin // 2
    M = B * H * W
    assert M % 8 == 0, "flattened B*H*W must be a multiple of 8"
    tm = _pick_tile(M, tm)

    # NCHW -> NHWC -> (M, Cin), bf16 for the MXU
    x = jnp.transpose(x_nchw, (0, 2, 3, 1)).reshape(M, Cin).astype(jnp.bfloat16)

    w1, b1, w2, b2, w3, wd, b3d = _fold_pack(p, Cin)

    full = lambda shape: pl.BlockSpec(shape, lambda i: (0,) * len(shape))

    # explicit VMEM budget: 2x-buffered x/out tiles + weights + intermediates
    est = (2 * tm * Cin * 2                                       # x tiles (bf16)
           + 2 * tm * 4 * C2 * 4                                  # out tiles (f32)
           + 2 * (Cin * C4 + C4 * 4 * C4 + C4 * C2 + Cin * 4 * C2) * 2   # weights bf16
           + 2 * (C4 + 4 * C4 + 4 * C2) * 4                              # biases f32
           + 2 * tm * (C4 + 4 * C4 + 2 * 4 * C2) * 4)                    # live intermediates
    vmem_limit = int(min(max(2 * est, 32 << 20), 64 << 20))

    out = pl.pallas_call(
        decoder_bottleneck_kernel,
        out_shape=jax.ShapeDtypeStruct((M, 4 * C2), jnp.float32),
        grid=(M // tm,),
        in_specs=[
            pl.BlockSpec((tm, Cin), lambda i: (i, 0)),            # x tile
            full((Cin, C4)), full((1, C4)),                       # conv1+bn1 (scale folded)
            full((C4, 4 * C4)), full((1, 4 * C4)),                # conv2+bn2 (wide, folded)
            full((C4, C2)),                                       # conv3 (scale folded)
            full((Cin, 4 * C2)), full((1, 4 * C2)),               # downsample + merged bias
        ],
        out_specs=pl.BlockSpec((tm, 4 * C2), lambda i: (i, 0)),
        compiler_params=pltpu.CompilerParams(
            dimension_semantics=("parallel",),
            vmem_limit_bytes=vmem_limit),
    )(x, w1, b1, w2, b2, w3, wd, b3d)

    # (M, 4*C2) lane blocks q = di*2+dj  -> interleave -> NCHW (B, C2, 2H, 2W)
    out = out.reshape(B, H, W, 2, 2, C2)                 # (B, H, W, di, dj, C2)
    out = jnp.transpose(out, (0, 1, 3, 2, 4, 5))         # (B, H, di, W, dj, C2)
    out = out.reshape(B, 2 * H, 2 * W, C2)
    return jnp.transpose(out, (0, 3, 1, 2))              # NCHW


# --------------------------------------------------------------------------
# Parameter construction (deterministic, inference-mode BN folding)
# --------------------------------------------------------------------------
def bn_fold(gamma, beta, mean, var, eps=1e-5):
    scale = gamma / jnp.sqrt(var + eps)
    bias = beta - mean * scale
    return scale.reshape(1, -1), bias.reshape(1, -1)


def make_params(key, Cin):
    C4, C2 = Cin // 4, Cin // 2
    ks = jax.random.split(key, 12)

    def bn_params(k, c):
        k1, k2, k3, k4 = jax.random.split(k, 4)
        gamma = 1.0 + 0.1 * jax.random.normal(k1, (c,), jnp.float32)
        beta = 0.1 * jax.random.normal(k2, (c,), jnp.float32)
        mean = 0.1 * jax.random.normal(k3, (c,), jnp.float32)
        var = jnp.abs(jax.random.normal(k4, (c,), jnp.float32)) + 0.5
        return bn_fold(gamma, beta, mean, var)

    # torch conv1 weight: (C4, Cin, 1, 1)   -> matmul weight (Cin, C4)
    w1 = 0.1 * jax.random.normal(ks[0], (Cin, C4), jnp.float32)
    s1, b1 = bn_params(ks[1], C4)
    # torch conv2 (ConvTranspose2d) weight: (C4, C4, 2, 2) -> (4, C4, C4), q = kh*2+kw
    w2 = 0.1 * jax.random.normal(ks[2], (C4, C4, 2, 2), jnp.float32)
    w2q = jnp.transpose(w2, (2, 3, 0, 1)).reshape(4, C4, C4)
    s2, b2 = bn_params(ks[3], C4)
    # torch conv3 weight: (C2, C4, 1, 1)   -> (C4, C2)
    w3 = 0.1 * jax.random.normal(ks[4], (C4, C2), jnp.float32)
    s3, b3 = bn_params(ks[5], C2)
    # downsample ConvTranspose2d weight: (Cin, C2, 2, 2) -> (4, Cin, C2), q = kh*2+kw
    wd = 0.1 * jax.random.normal(ks[6], (Cin, C2, 2, 2), jnp.float32)
    wdq = jnp.transpose(wd, (2, 3, 0, 1)).reshape(4, Cin, C2)
    sd, bd = bn_params(ks[7], C2)

    return dict(w1=w1, s1=s1, b1=b1, w2q=w2q, s2=s2, b2=b2,
                w3=w3, s3=s3, b3=b3, wdq=wdq, sd=sd, bd=bd)


# --------------------------------------------------------------------------
# Pure-JAX reference (NHWC, f32 accumulation of bf16-rounded matmul inputs,
# matching the kernel's MXU precision and BN-scale folding point, which is
# mathematically identical to the PyTorch module's inference-mode forward)
# --------------------------------------------------------------------------
def reference(x_nchw, p):
    rd = lambda a: a.astype(jnp.bfloat16).astype(jnp.float32)   # bf16 rounding
    hi = jax.lax.Precision.HIGHEST
    x = rd(jnp.transpose(x_nchw, (0, 2, 3, 1)).astype(jnp.float32))   # NHWC

    # fold BN scales into weights (exact in real arithmetic: s*(x@w) == x@(w*s)),
    # then round to bf16 at the same point the kernel does.
    w1f = rd(p["w1"] * p["s1"])                 # (Cin, C4)
    w2qf = rd(p["w2q"] * p["s2"])               # (4, C4, C4)
    w3f = rd(p["w3"] * p["s3"])                 # (C4, C2)
    wdqf = rd(p["wdq"] * p["sd"])               # (4, Cin, C2)
    b1 = p["b1"].reshape(-1)
    b2 = p["b2"].reshape(-1)
    b3d = (p["b3"] + p["bd"]).reshape(-1)

    def tconv2x2(y, wq):
        Bq, Hq, Wq, _ = y.shape
        Co = wq.shape[-1]
        out = jnp.zeros((Bq, 2 * Hq, 2 * Wq, Co), jnp.float32)
        for di in range(2):
            for dj in range(2):
                out = out.at[:, di::2, dj::2, :].set(
                    jnp.einsum("bhwc,co->bhwo", y, wq[di * 2 + dj], precision=hi))
        return out

    h = jax.nn.relu(jnp.einsum("bhwc,cd->bhwd", x, w1f, precision=hi) + b1)
    y = jax.nn.relu(tconv2x2(rd(h), w2qf) + b2)
    z = jnp.einsum("bhwc,cd->bhwd", rd(y), w3f, precision=hi)
    idn = tconv2x2(x, wdqf)
    out = jax.nn.relu(z + idn + b3d)
    return jnp.transpose(out, (0, 3, 1, 2))                        # NCHW


if __name__ == "__main__":
    key = jax.random.PRNGKey(0)
    kx, kp = jax.random.split(key)

    B, Cin, H, W = 2, 16, 16, 16      # small shapes; Cin divisible by 4; M = 512
    x = jax.random.normal(kx, (B, Cin, H, W), jnp.float32)
    params = make_params(kp, Cin)

    out = jax.block_until_ready(decoder_bottleneck(x, params, tm=256))
    ref = jax.block_until_ready(reference(x, params))

    assert out.shape == (B, Cin // 2, 2 * H, 2 * W), out.shape
    np.testing.assert_allclose(np.asarray(out), np.asarray(ref), rtol=2e-2, atol=1e-2)

    print("KERNEL_OK")
</pallas_src>

<mosaic_0001>
module attributes {stable_mosaic.version = 11 : i64} {
  func.func @decoder_bottleneck_kernel(%arg0: i32, %arg1: memref<256x16xbf16, #tpu.memory_space<vmem>>, %arg2: memref<16x4xbf16, #tpu.memory_space<vmem>>, %arg3: memref<1x4xf32, #tpu.memory_space<vmem>>, %arg4: memref<4x16xbf16, #tpu.memory_space<vmem>>, %arg5: memref<1x16xf32, #tpu.memory_space<vmem>>, %arg6: memref<4x8xbf16, #tpu.memory_space<vmem>>, %arg7: memref<16x32xbf16, #tpu.memory_space<vmem>>, %arg8: memref<1x32xf32, #tpu.memory_space<vmem>>, %arg9: memref<256x32xf32, #tpu.memory_space<vmem>>) attributes {dimension_semantics = [#tpu.dimension_semantics<parallel>], iteration_bounds = array<i64: 2>, scalar_prefetch = 0 : i64, scratch_operands = 0 : i64, tpu.core_type = #tpu.core_type<tc>, window_params = [{transform_indices = @transform_0, window_bounds = array<i64: 256, 16>}, {pipeline_mode = #tpu.pipeline_mode<synchronous>, transform_indices = @transform_1, window_bounds = array<i64: 16, 4>}, {pipeline_mode = #tpu.pipeline_mode<synchronous>, transform_indices = @transform_2, window_bounds = array<i64: 1, 4>}, {pipeline_mode = #tpu.pipeline_mode<synchronous>, transform_indices = @transform_3, window_bounds = array<i64: 4, 16>}, {pipeline_mode = #tpu.pipeline_mode<synchronous>, transform_indices = @transform_4, window_bounds = array<i64: 1, 16>}, {pipeline_mode = #tpu.pipeline_mode<synchronous>, transform_indices = @transform_5, window_bounds = array<i64: 4, 8>}, {pipeline_mode = #tpu.pipeline_mode<synchronous>, transform_indices = @transform_6, window_bounds = array<i64: 16, 32>}, {pipeline_mode = #tpu.pipeline_mode<synchronous>, transform_indices = @transform_7, window_bounds = array<i64: 1, 32>}, {transform_indices = @transform_8, window_bounds = array<i64: 256, 32>}]} {
    %c0 = arith.constant 0 : index
    %c0_0 = arith.constant 0 : index
    %0 = vector.load %arg1[%c0, %c0_0] : memref<256x16xbf16, #tpu.memory_space<vmem>>, vector<256x16xbf16>
    %c0_1 = arith.constant 0 : index
    %c0_2 = arith.constant 0 : index
    %1 = vector.load %arg3[%c0_1, %c0_2] : memref<1x4xf32, #tpu.memory_space<vmem>>, vector<1x4xf32>
    %c0_3 = arith.constant 0 : index
    %c0_4 = arith.constant 0 : index
    %2 = vector.load %arg5[%c0_3, %c0_4] : memref<1x16xf32, #tpu.memory_space<vmem>>, vector<1x16xf32>
    %c0_5 = arith.constant 0 : index
    %c0_6 = arith.constant 0 : index
    %3 = vector.load %arg8[%c0_5, %c0_6] : memref<1x32xf32, #tpu.memory_space<vmem>>, vector<1x32xf32>
    %c0_7 = arith.constant 0 : index
    %c0_8 = arith.constant 0 : index
    %4 = vector.load %arg2[%c0_7, %c0_8] : memref<16x4xbf16, #tpu.memory_space<vmem>>, vector<16x4xbf16>
    %cst = arith.constant dense<0.000000e+00> : vector<256x4xf32>
    %5 = tpu.matmul %0, %4, %cst {dimension_numbers = #tpu.dot_dimension_numbers<[1], [0], [0], [1], [0, 0, 1, 1], [], []>} : vector<256x16xbf16>, vector<16x4xbf16>, vector<256x4xf32> -> vector<256x4xf32>
    %6 = vector.broadcast %1 : vector<1x4xf32> to vector<256x4xf32>
    %7 = arith.addf %5, %6 : vector<256x4xf32>
    %cst_9 = arith.constant 0.000000e+00 : f32
    %8 = vector.broadcast %cst_9 : f32 to vector<256x4xf32>
    %9 = arith.maximumf %7, %8 : vector<256x4xf32>
    %10 = arith.truncf %9 : vector<256x4xf32> to vector<256x4xbf16>
    %c0_10 = arith.constant 0 : index
    %c0_11 = arith.constant 0 : index
    %11 = vector.load %arg4[%c0_10, %c0_11] : memref<4x16xbf16, #tpu.memory_space<vmem>>, vector<4x16xbf16>
    %cst_12 = arith.constant dense<0.000000e+00> : vector<256x16xf32>
    %12 = tpu.matmul %10, %11, %cst_12 {dimension_numbers = #tpu.dot_dimension_numbers<[1], [0], [0], [1], [0, 0, 1, 1], [], []>} : vector<256x4xbf16>, vector<4x16xbf16>, vector<256x16xf32> -> vector<256x16xf32>
    %13 = vector.broadcast %2 : vector<1x16xf32> to vector<256x16xf32>
    %14 = arith.addf %12, %13 : vector<256x16xf32>
    %cst_13 = arith.constant 0.000000e+00 : f32
    %15 = vector.broadcast %cst_13 : f32 to vector<256x16xf32>
    %16 = arith.maximumf %14, %15 : vector<256x16xf32>
    %17 = arith.truncf %16 : vector<256x16xf32> to vector<256x16xbf16>
    %c0_14 = arith.constant 0 : index
    %c0_15 = arith.constant 0 : index
    %18 = vector.load %arg7[%c0_14, %c0_15] : memref<16x32xbf16, #tpu.memory_space<vmem>>, vector<16x32xbf16>
    %cst_16 = arith.constant dense<0.000000e+00> : vector<256x32xf32>
    %19 = tpu.matmul %0, %18, %cst_16 {dimension_numbers = #tpu.dot_dimension_numbers<[1], [0], [0], [1], [0, 0, 1, 1], [], []>} : vector<256x16xbf16>, vector<16x32xbf16>, vector<256x32xf32> -> vector<256x32xf32>
    %c0_17 = arith.constant 0 : index
    %c0_18 = arith.constant 0 : index
    %20 = vector.load %arg6[%c0_17, %c0_18] : memref<4x8xbf16, #tpu.memory_space<vmem>>, vector<4x8xbf16>
    %21 = vector.extract_strided_slice %17 {offsets = [0, 0], sizes = [256, 4], strides = [1, 1]} : vector<256x16xbf16> to vector<256x4xbf16>
    %cst_19 = arith.constant dense<0.000000e+00> : vector<256x8xf32>
    %22 = tpu.matmul %21, %20, %cst_19 {dimension_numbers = #tpu.dot_dimension_numbers<[1], [0], [0], [1], [0, 0, 1, 1], [], []>} : vector<256x4xbf16>, vector<4x8xbf16>, vector<256x8xf32> -> vector<256x8xf32>
    %23 = vector.extract_strided_slice %17 {offsets = [0, 4], sizes = [256, 4], strides = [1, 1]} : vector<256x16xbf16> to vector<256x4xbf16>
    %cst_20 = arith.constant dense<0.000000e+00> : vector<256x8xf32>
    %24 = tpu.matmul %23, %20, %cst_20 {dimension_numbers = #tpu.dot_dimension_numbers<[1], [0], [0], [1], [0, 0, 1, 1], [], []>} : vector<256x4xbf16>, vector<4x8xbf16>, vector<256x8xf32> -> vector<256x8xf32>
    %25 = vector.extract_strided_slice %17 {offsets = [0, 8], sizes = [256, 4], strides = [1, 1]} : vector<256x16xbf16> to vector<256x4xbf16>
    %cst_21 = arith.constant dense<0.000000e+00> : vector<256x8xf32>
    %26 = tpu.matmul %25, %20, %cst_21 {dimension_numbers = #tpu.dot_dimension_numbers<[1], [0], [0], [1], [0, 0, 1, 1], [], []>} : vector<256x4xbf16>, vector<4x8xbf16>, vector<256x8xf32> -> vector<256x8xf32>
    %27 = vector.extract_strided_slice %17 {offsets = [0, 12], sizes = [256, 4], strides = [1, 1]} : vector<256x16xbf16> to vector<256x4xbf16>
    %cst_22 = arith.constant dense<0.000000e+00> : vector<256x8xf32>
    %28 = tpu.matmul %27, %20, %cst_22 {dimension_numbers = #tpu.dot_dimension_numbers<[1], [0], [0], [1], [0, 0, 1, 1], [], []>} : vector<256x4xbf16>, vector<4x8xbf16>, vector<256x8xf32> -> vector<256x8xf32>
    %29 = tpu.concatenate %22, %24, %26, %28 in 1 : vector<256x8xf32>, vector<256x8xf32>, vector<256x8xf32>, vector<256x8xf32> -> vector<256x32xf32>
    %30 = arith.addf %29, %19 : vector<256x32xf32>
    %31 = vector.broadcast %3 : vector<1x32xf32> to vector<256x32xf32>
    %32 = arith.addf %30, %31 : vector<256x32xf32>
    %cst_23 = arith.constant 0.000000e+00 : f32
    %33 = vector.broadcast %cst_23 : f32 to vector<256x32xf32>
    %34 = arith.maximumf %32, %33 : vector<256x32xf32>
    %c0_24 = arith.constant 0 : index
    %c0_25 = arith.constant 0 : index
    %35 = vector.load %arg9[%c0_24, %c0_25] : memref<256x32xf32, #tpu.memory_space<vmem>>, vector<256x32xf32>
    tpu.vector_store %arg9[%c0_24, %c0_25], %34 {strides = array<i32>} : memref<256x32xf32, #tpu.memory_space<vmem>>, vector<256x32xf32>,
    return
  }
  func.func @transform_0(%arg0: i32) -> (i32, i32) {
    %c0_i32 = arith.constant 0 : i32
    %c0_i32_0 = arith.constant 0 : i32
    return %arg0, %c0_i32 : i32, i32
  }
  func.func @transform_1(%arg0: i32) -> (i32, i32) {
    %c0_i32 = arith.constant 0 : i32
    %c0_i32_0 = arith.constant 0 : i32
    %c0_i32_1 = arith.constant 0 : i32
    return %c0_i32, %c0_i32_0 : i32, i32
  }
  func.func @transform_2(%arg0: i32) -> (i32, i32) {
    %c0_i32 = arith.constant 0 : i32
    %c0_i32_0 = arith.constant 0 : i32
    %c0_i32_1 = arith.constant 0 : i32
    return %c0_i32, %c0_i32_0 : i32, i32
  }
  func.func @transform_3(%arg0: i32) -> (i32, i32) {
    %c0_i32 = arith.constant 0 : i32
    %c0_i32_0 = arith.constant 0 : i32
    %c0_i32_1 = arith.constant 0 : i32
    return %c0_i32, %c0_i32_0 : i32, i32
  }
  func.func @transform_4(%arg0: i32) -> (i32, i32) {
    %c0_i32 = arith.constant 0 : i32
    %c0_i32_0 = arith.constant 0 : i32
    %c0_i32_1 = arith.constant 0 : i32
    return %c0_i32, %c0_i32_0 : i32, i32
  }
  func.func @transform_5(%arg0: i32) -> (i32, i32) {
    %c0_i32 = arith.constant 0 : i32
    %c0_i32_0 = arith.constant 0 : i32
    %c0_i32_1 = arith.constant 0 : i32
    return %c0_i32, %c0_i32_0 : i32, i32
  }
  func.func @transform_6(%arg0: i32) -> (i32, i32) {
    %c0_i32 = arith.constant 0 : i32
    %c0_i32_0 = arith.constant 0 : i32
    %c0_i32_1 = arith.constant 0 : i32
    return %c0_i32, %c0_i32_0 : i32, i32
  }
  func.func @transform_7(%arg0: i32) -> (i32, i32) {
    %c0_i32 = arith.constant 0 : i32
    %c0_i32_0 = arith.constant 0 : i32
    %c0_i32_1 = arith.constant 0 : i32
    return %c0_i32, %c0_i32_0 : i32, i32
  }
  func.func @transform_8(%arg0: i32) -> (i32, i32) {
    %c0_i32 = arith.constant 0 : i32
    %c0_i32_0 = arith.constant 0 : i32
    return %arg0, %c0_i32 : i32, i32
  }
}

</mosaic_0001>

<bundles_post_ra>
// kernel: tpu_custom_call.1
= control target key start
LH: loop header
LB: loop body
LE: loop exit
PB: predicated region body
PF: predicated region fallthrough
CT: control target
= control target key end

     0   :  { %s3359_s27 = smov 0   ;;  %s4552_s0 = inlined_call_operand.vmem [shape: bf16[512,16], index: 0, kind: input, shape index: {}]   ;;  %s4553_s1 = inlined_call_operand.vmem [shape: bf16[16,4], index: 1, kind: input, shape index: {}]   ;;  %s4554_s2 = inlined_call_operand.vmem [shape: f32[1,4], index: 2, kind: input, shape index: {}]   ;;  %s4555_s3 = inlined_call_operand.vmem [shape: bf16[4,16], index: 3, kind: input, shape index: {}]   ;;  %s4556_s4 = inlined_call_operand.vmem [shape: f32[1,16], index: 4, kind: input, shape index: {}]   ;;  %s4557_s5 = inlined_call_operand.vmem [shape: bf16[4,8], index: 5, kind: input, shape index: {}]   ;;  %s4558_s6 = inlined_call_operand.vmem [shape: bf16[16,32], index: 6, kind: input, shape index: {}]   ;;  %s4559_s7 = inlined_call_operand.vmem [shape: f32[1,32], index: 7, kind: input, shape index: {}]   ;;  %s4560_s8 = inlined_call_operand.vmem [shape: f32[512,32], index: 8, kind: output, shape index: {}]  }
   0x1 LB: > { %s2760_s28 = sadd.s32 4294967295, %s3306_s27   ;;  %p2764_p0 = scmp.ge.s32.totalorder %s3306_s27, 1  ;;  %s3306_s27 = sphi %s3359_s27, %s18_s27  }
   0x2   : > { %p263_p1 = scmp.lt.s32.totalorder %s3306_s27, 3 }
   0x4   : > { %p264_p2 = pnand %p2764_p0, %p263_p1 }
   0x6   : > { %267 = sbr.rel (%p264_p2) target bundleno = 1161 (0x489), region = 52 }
   0xd   : > { %v3282_v0 = vld [vmem:[%s4553_s1] sm:$0xff]   ;;  %s2765_s9 = sshll.u32 %s2760_s28, 5  ;;  %vm753_vm0 = vcmask 1041408   ;;  %vm439_vm1 = vcmask 130048   ;;  %vm704_vm2 = vcmask 31744   ;;  %s3308_s24 = smov 124  }
   0xe   : > { %p298_p3 = scmp.lt.s32.totalorder %s2765_s9, 63  ;;  %v697_v1 = vld [vmem:[%s4555_s3] sm:$0x3]  ;;  %3023 = vmatprep.subr.bf16.mxu0 %v3282_v0  ;;  %3261 = vmatprep.subr.bf16.mxu1 %v3282_v0  ;;  %s3309_s25 = smov 120   ;;  %vm2471_vm3 = vcmask 64512   ;;  %vm2536_vm4 = vcmask 195584  }
   0xf   : > { %3024 = vmatpush3.bf16.msra.mxu0 %v3282_v0  ;;  %3262 = vmatpush3.bf16.msra.mxu1 %v3282_v0  ;;  %v755_v10 = vsel %vm753_vm0, %v697_v1, 0  ;;  %v3464_v19 = vld [vmem:[%s4554_s2] ss:$0 sm:$0xff]  ;;  %s3310_s26 = smov 116   ;;  %s3311_s28 = smov 8   ;;  %vm2671_vm5 = vcmask 261120  }
  0x10   : > { %s4698_s9 = smov (!%p298_p3, %s2765_s9), 63  ;;  %3263 = vmatprep.subr.msk.bf16.mxu1 %vm753_vm0, %v697_v1  ;;  %s3312_s29 = smov 16  }
  0x11   : > { %s2766_s12 = sshll.u32 %s4698_s9, 2  ;;  %s3313_s30 = smov 24  }
  0x12   : > { %s3380_s15 = scalar_lea.vmem %s4552_s0, %s2766_s12  ;;  %s2768_s12 = sshll.u32 %s4698_s9, 3 }
  0x13   : > { %v3283_v2 = vld [vmem:[%s3380_s15] sm:$0xff]   ;;  %v3384_v3 = vld [vmem:[%s3380_s15 + $0x8] sm:$0xff]   ;;  %v3388_v4 = vld [vmem:[%s3380_s15 + $0x10] sm:$0xff]  }
  0x14   : > { %3025 = vmatprep.mubr.msk.bf16.mxu0 %vm439_vm1, %v3283_v2  ;;  %v3395_v5 = vld [vmem:[%s3380_s15 + $0x18] sm:$0xff]   ;;  %v3398_v6 = vld [vmem:[%s3380_s15 + $0x20] sm:$0xff]   ;;  %v3404_v8 = vld [vmem:[%s3380_s15 + $0x48] sm:$0xff]  }
  0x15   : > { %3026 = vmatmul.mubr.msk.bf16.vlgmr.msra.gmra.mrb[0].mxu0 %vm439_vm1, %v3384_v3  ;;  %v3401_v7 = vld [vmem:[%s3380_s15 + $0x40] sm:$0xff]   ;;  %v3409_v9 = vld [vmem:[%s3380_s15 + $0x50] sm:$0xff]   ;;  %v3421_v11 = vld [vmem:[%s3380_s15 + $0x28] sm:$0xff]  }
  0x16   : > { %3029 = vmatprep.mubr.msk.bf16.mxu0 %vm439_vm1, %v3388_v4  ;;  %3041 = vmatprep.mubr.msk.bf16.mxu1 %vm439_vm1, %v3401_v7  ;;  %v3424_v12 = vld [vmem:[%s3380_s15 + $0x58] sm:$0xff]   ;;  %v3427_v13 = vld [vmem:[%s3380_s15 + $0x30] sm:$0xff]   ;;  %v3430_v14 = vld [vmem:[%s3380_s15 + $0x60] sm:$0xff]  }
  0x17   : > { %3042 = vmatmul.mubr.msk.bf16.vlgmr.msra.gmra.mrb[0].mxu1 %vm439_vm1, %v3404_v8  ;;  %v3441_v15 = vld [vmem:[%s3380_s15 + $0x38] sm:$0xff]   ;;  %v3444_v16 = vld [vmem:[%s3380_s15 + $0x68] sm:$0xff]   ;;  %v3447_v17 = vld [vmem:[%s3380_s15 + $0x70] sm:$0xff]  }
  0x18   : > { %3045 = vmatprep.mubr.msk.bf16.mxu1 %vm439_vm1, %v3409_v9  ;;  %3058 = vmatpush3.bf16.msra.mxu1 %v755_v10  ;;  %v3457_v18 = vld [vmem:[%s3380_s15 + $0x78] sm:$0xff]   ;;  %s4354_s15 = scalar_lea.vmem %s4560_s8, %s2768_s12 }
  0x1d   : > { %3030 = vmatmul.mubr.msk.bf16.gmra.mrb[4].mxu0 %vm439_vm1, %v3395_v5 }
  0x1e   : > { %3033 = vmatprep.mubr.msk.bf16.mxu0 %vm439_vm1, %v3398_v6 }
  0x1f   : > { %3046 = vmatmul.mubr.msk.bf16.gmra.mrb[4].mxu1 %vm439_vm1, %v3424_v12 }
  0x20   : > { %3049 = vmatprep.mubr.msk.bf16.mxu1 %vm439_vm1, %v3430_v14 }
  0x25   : > { %3034 = vmatmul.mubr.msk.bf16.gmra.mrb[8].mxu0 %vm439_vm1, %v3421_v11 }
  0x26   : > { %3037 = vmatprep.mubr.msk.bf16.mxu0 %vm439_vm1, %v3427_v13 }
  0x27   : > { %3050 = vmatmul.mubr.msk.bf16.gmra.mrb[8].mxu1 %vm439_vm1, %v3444_v16 }
  0x28   : > { %3053 = vmatprep.mubr.msk.bf16.mxu1 %vm439_vm1, %v3447_v17 }
  0x2d   : > { %3038 = vmatmul.mubr.msk.bf16.gmra.mrb[12].mxu0 %vm439_vm1, %v3441_v15 }
  0x2e   : > { %3093 = vmatprep.mubr.msk.bf16.mxu0 %vm439_vm1, %v3283_v2 }
  0x2f   : > { %3054 = vmatmul.mubr.msk.bf16.gmra.mrb[12].mxu1 %vm439_vm1, %v3457_v18 }
  0xe8   : > { %v3027_v20 = vpop.f32.mrb[0].mxu0 }
  0xe9   : > { %v531_v21 = vadd.f32 %v3027_v20, %v3464_v19  ;;  %v522_v22 = vpop.f32.mrb[1].mxu0 }
  0xea   : > { %v523_v23 = vadd.f32 %v3464_v19, %v522_v22  ;;  %v3028_v24 = vpop.f32.mrb[2].mxu0  ;;  %v3043_v35 = vpop.f32.mrb[0].mxu1 }
  0xeb   : > { %v534_v25 = vadd.f32 %v3028_v24, %v3464_v19  ;;  %v525_v26 = vpop.f32.mrb[3].mxu0  ;;  %v651_v28 = vmax.f32 %v531_v21, 0.0  ;;  %v595_v38 = vadd.f32 %v3043_v35, %v3464_v19  ;;  %v586_v39 = vpop.f32.mrb[1].mxu1 }
  0xec   : > { %v526_v27 = vadd.f32 %v3464_v19, %v525_v26  ;;  %v649_v30 = vmax.f32 %v523_v23, 0.0  ;;  %v587_v42 = vadd.f32 %v3464_v19, %v586_v39  ;;  %v3044_v43 = vpop.f32.mrb[2].mxu1 }
  0xed   : > { %v652_v29 = vmax.f32 %v534_v25, 0.0  ;;  %v667_v46 = vmax.f32 %v595_v38, 0.0  ;;  %v598_v47 = vadd.f32 %v3044_v43, %v3464_v19  ;;  %v589_v48 = vpop.f32.mrb[3].mxu1 }
  0xee   : > { %v650_v31 = vmax.f32 %v526_v27, 0.0  ;;  %v665_v50 = vmax.f32 %v587_v42, 0.0  ;;  %v590_v51 = vadd.f32 %v3464_v19, %v589_v48 }
  0xef   : > { %v682_v32 = vpack.c.bf16 %v652_v29, %v651_v28  ;;  %v668_v54 = vmax.f32 %v598_v47, 0.0 }
  0xf0   : > { %v681_v33 = vpack.c.bf16 %v650_v31, %v649_v30  ;;  %v3031_v34 = vpop.f32.mrb[4].mxu0  ;;  %v666_v57 = vmax.f32 %v590_v51, 0.0 }
  0xf1   : > { %v547_v36 = vadd.f32 %v3031_v34, %v3464_v19  ;;  %v538_v37 = vpop.f32.mrb[5].mxu0  ;;  %v3480_v59 = vpack.c.bf16 %v668_v54, %v667_v46 }
  0xf2   : > { %v539_v40 = vadd.f32 %v3464_v19, %v538_v37  ;;  %v3032_v41 = vpop.f32.mrb[6].mxu0  ;;  %3059 = vmatprep.mubr.msk.bf16.mxu1 %vm704_vm2, %v681_v33  ;;  %v3482_v62 = vpack.c.bf16 %v666_v57, %v665_v50  ;;  %v3047_v63 = vpop.f32.mrb[4].mxu1 }
  0xf3   : > { %v550_v44 = vadd.f32 %v3032_v41, %v3464_v19  ;;  %v541_v45 = vpop.f32.mrb[7].mxu0  ;;  %3060 = vmatmul.mubr.msk.bf16.vlgmr.msra.gmra.mrb[16].mxu1 %vm704_vm2, %v682_v32  ;;  %v655_v52 = vmax.f32 %v547_v36, 0.0  ;;  %v611_v2 = vadd.f32 %v3047_v63, %v3464_v19  ;;  %v602_v10 = vpop.f32.mrb[5].mxu1 }
  0xf4   : > { %v542_v49 = vadd.f32 %v3464_v19, %v541_v45  ;;  %v653_v55 = vmax.f32 %v539_v40, 0.0  ;;  %v603_v22 = vadd.f32 %v3464_v19, %v602_v10  ;;  %v3048_v23 = vpop.f32.mrb[6].mxu1 }
  0xf5   : > { %v656_v53 = vmax.f32 %v550_v44, 0.0  ;;  %v671_v26 = vmax.f32 %v611_v2, 0.0  ;;  %v614_v27 = vadd.f32 %v3048_v23, %v3464_v19  ;;  %v605_v28 = vpop.f32.mrb[7].mxu1 }
  0xf6   : > { %v654_v56 = vmax.f32 %v542_v49, 0.0  ;;  %v669_v30 = vmax.f32 %v603_v22, 0.0  ;;  %v606_v31 = vadd.f32 %v3464_v19, %v605_v28 }
  0xf7   : > { %v684_v58 = vpack.c.bf16 %v656_v53, %v655_v52  ;;  %v672_v34 = vmax.f32 %v614_v27, 0.0 }
  0xf8   : > { %v683_v60 = vpack.c.bf16 %v654_v56, %v653_v55  ;;  %v3035_v61 = vpop.f32.mrb[8].mxu0  ;;  %v670_v37 = vmax.f32 %v606_v31, 0.0 }
  0xf9   : > { %v563_v0 = vadd.f32 %v3035_v61, %v3464_v19  ;;  %v554_v1 = vpop.f32.mrb[9].mxu0  ;;  %v692_v39 = vpack.c.bf16 %v672_v34, %v671_v26 }
  0xfa   : > { %v555_v20 = vadd.f32 %v3464_v19, %v554_v1  ;;  %v3036_v21 = vpop.f32.mrb[10].mxu0  ;;  %3063 = vmatprep.mubr.msk.bf16.mxu1 %vm704_vm2, %v683_v60  ;;  %v691_v42 = vpack.c.bf16 %v670_v37, %v669_v30  ;;  %v3051_v43 = vpop.f32.mrb[8].mxu1 }
  0xfb   : > { %v566_v24 = vadd.f32 %v3036_v21, %v3464_v19  ;;  %v557_v25 = vpop.f32.mrb[11].mxu0  ;;  %3064 = vmatmul.mubr.msk.bf16.gmra.mrb[20].mxu1 %vm704_vm2, %v684_v58  ;;  %v659_v32 = vmax.f32 %v563_v0, 0.0  ;;  %v627_v46 = vadd.f32 %v3051_v43, %v3464_v19  ;;  %v618_v47 = vpop.f32.mrb[9].mxu1 }
  0xfc   : > { %v558_v29 = vadd.f32 %v3464_v19, %v557_v25  ;;  %v657_v35 = vmax.f32 %v555_v20, 0.0  ;;  %v619_v50 = vadd.f32 %v3464_v19, %v618_v47  ;;  %v3052_v51 = vpop.f32.mrb[10].mxu1 }
  0xfd   : > { %v660_v33 = vmax.f32 %v566_v24, 0.0  ;;  %v675_v54 = vmax.f32 %v627_v46, 0.0  ;;  %v630_v55 = vadd.f32 %v3052_v51, %v3464_v19  ;;  %v621_v56 = vpop.f32.mrb[11].mxu1 }
  0xfe   : > { %v658_v36 = vmax.f32 %v558_v29, 0.0  ;;  %v673_v58 = vmax.f32 %v619_v50, 0.0  ;;  %v622_v60 = vadd.f32 %v3464_v19, %v621_v56 }
  0xff   : > { %v686_v38 = vpack.c.bf16 %v660_v33, %v659_v32  ;;  %v676_v0 = vmax.f32 %v630_v55, 0.0 }
 0x100   : > { %v685_v40 = vpack.c.bf16 %v658_v36, %v657_v35  ;;  %v3039_v41 = vpop.f32.mrb[12].mxu0  ;;  %v674_v10 = vmax.f32 %v622_v60, 0.0 }
 0x101   : > { %v579_v44 = vadd.f32 %v3039_v41, %v3464_v19  ;;  %v570_v45 = vpop.f32.mrb[13].mxu0  ;;  %v694_v21 = vpack.c.bf16 %v676_v0, %v675_v54 }
 0x102   : > { %v571_v48 = vadd.f32 %v3464_v19, %v570_v45  ;;  %v3040_v49 = vpop.f32.mrb[14].mxu0  ;;  %3067 = vmatprep.mubr.msk.bf16.mxu1 %vm704_vm2, %v685_v40  ;;  %v693_v23 = vpack.c.bf16 %v674_v10, %v673_v58  ;;  %v3055_v24 = vpop.f32.mrb[12].mxu1 }
 0x103   : > { %v582_v52 = vadd.f32 %v3040_v49, %v3464_v19  ;;  %v573_v53 = vpop.f32.mrb[15].mxu0  ;;  %3068 = vmatmul.mubr.msk.bf16.gmra.mrb[24].mxu1 %vm704_vm2, %v686_v38  ;;  %v663_v61 = vmax.f32 %v579_v44, 0.0  ;;  %v643_v25 = vadd.f32 %v3055_v24, %v3464_v19  ;;  %v634_v26 = vpop.f32.mrb[13].mxu1 }
 0x104   : > { %v574_v57 = vadd.f32 %v3464_v19, %v573_v53  ;;  %v661_v1 = vmax.f32 %v571_v48, 0.0  ;;  %v635_v27 = vadd.f32 %v3464_v19, %v634_v26  ;;  %v3056_v28 = vpop.f32.mrb[14].mxu1 }
 0x105   : > { %v664_v63 = vmax.f32 %v582_v52, 0.0  ;;  %v679_v29 = vmax.f32 %v643_v25, 0.0  ;;  %v646_v30 = vadd.f32 %v3056_v28, %v3464_v19  ;;  %v637_v31 = vpop.f32.mrb[15].mxu1 }
 0x106   : > { %v662_v2 = vmax.f32 %v574_v57, 0.0  ;;  %v677_v32 = vmax.f32 %v635_v27, 0.0  ;;  %v638_v33 = vadd.f32 %v3464_v19, %v637_v31  ;;  %v1135_v19 = vld [vmem:[%s4557_s5] sm:$0x3] }
 0x107   : > { %v688_v20 = vpack.c.bf16 %v664_v63, %v663_v61  ;;  %v680_v34 = vmax.f32 %v646_v30, 0.0  ;;  %3264 = vmatprep.subr.msk.bf16.mxu1 %vm753_vm0, %v1135_v19 }
 0x108   : > { %v687_v22 = vpack.c.bf16 %v662_v2, %v661_v1  ;;  %v678_v35 = vmax.f32 %v638_v33, 0.0 }
 0x109   : > { %v696_v36 = vpack.c.bf16 %v680_v34, %v679_v29 }
 0x10a   : > { %3071 = vmatprep.mubr.msk.bf16.mxu1 %vm704_vm2, %v687_v22  ;;  %v695_v37 = vpack.c.bf16 %v678_v35, %v677_v32 }
 0x10b   : > { %3072 = vmatmul.mubr.msk.bf16.gmra.mrb[28].mxu1 %vm704_vm2, %v688_v20 }
 0x10c   : > { %3075 = vmatprep.mubr.msk.bf16.mxu1 %vm704_vm2, %v3482_v62  ;;  %v3299_v62 = vld [vmem:[%s4558_s6] sm:$0xff]  }
 0x10d   : > { %3091 = vmatprep.subr.bf16.mxu0 %v3299_v62 }
 0x10e   : > { %3092 = vmatpush3.bf16.msra.mxu0 %v3299_v62 }
 0x10f   : > { %3265 = vmatprep.subr.msk.bf16.mxu0 %vm753_vm0, %v1135_v19 }
 0x111   : > { %3094 = vmatmul.mubr.msk.bf16.vlgmr.msra.gmra.mrb[16].mxu0 %vm439_vm1, %v3384_v3  ;;  %v3568_v3 = vld [vmem:[%s4556_s4] ss:$0 sm:$0xff] }
 0x112   : > { %3097 = vmatprep.mubr.msk.bf16.mxu0 %vm439_vm1, %v3388_v4 }
 0x113   : > { %3076 = vmatmul.mubr.msk.bf16.gmra.mrb[32].mxu1 %vm704_vm2, %v3480_v59  ;;  %v3525_v59 = vsel %vm753_vm0, %v1135_v19, 0 }
 0x114   : > { %3079 = vmatprep.mubr.msk.bf16.mxu1 %vm704_vm2, %v691_v42  ;;  %3126 = vmatpush3.bf16.msra.mxu1 %v3525_v59 }
 0x115   : > { %3266 = vmatprep.subr.msk.bf16.mxu1 %vm753_vm0, %v1135_v19  ;;  %3160 = vmatpush3.bf16.msra.mxu0 %v3525_v59 }
 0x116   : > { %3267 = vmatprep.subr.msk.bf16.mxu0 %vm753_vm0, %v1135_v19 }
 0x119   : > { %3098 = vmatmul.mubr.msk.bf16.gmra.mrb[20].mxu0 %vm439_vm1, %v3395_v5 }
 0x11a   : > { %3101 = vmatprep.mubr.msk.bf16.mxu0 %vm439_vm1, %v3398_v6 }
 0x11b   : > { %3080 = vmatmul.mubr.msk.bf16.gmra.mrb[36].mxu1 %vm704_vm2, %v692_v39 }
 0x11c   : > { %3083 = vmatprep.mubr.msk.bf16.mxu1 %vm704_vm2, %v693_v23 }
 0x121   : > { %3102 = vmatmul.mubr.msk.bf16.gmra.mrb[24].mxu0 %vm439_vm1, %v3421_v11 }
 0x122   : > { %3105 = vmatprep.mubr.msk.bf16.mxu0 %vm439_vm1, %v3427_v13 }
 0x123   : > { %3084 = vmatmul.mubr.msk.bf16.gmra.mrb[40].mxu1 %vm704_vm2, %v694_v21 }
 0x124   : > { %3087 = vmatprep.mubr.msk.bf16.mxu1 %vm704_vm2, %v695_v37 }
 0x129   : > { %3106 = vmatmul.mubr.msk.bf16.gmra.mrb[28].mxu0 %vm439_vm1, %v3441_v15 }
 0x12a   : > { %3109 = vmatprep.mubr.msk.bf16.mxu0 %vm439_vm1, %v3401_v7 }
 0x12b   : > { %3088 = vmatmul.mubr.msk.bf16.gmra.mrb[44].mxu1 %vm704_vm2, %v696_v36 }
 0x131   : > { %3110 = vmatmul.mubr.msk.bf16.gmra.mrb[32].mxu0 %vm439_vm1, %v3404_v8 }
 0x132   : > { %3113 = vmatprep.mubr.msk.bf16.mxu0 %vm439_vm1, %v3409_v9 }
 0x139   : > { %3114 = vmatmul.mubr.msk.bf16.gmra.mrb[36].mxu0 %vm439_vm1, %v3424_v12 }
 0x13a   : > { %3117 = vmatprep.mubr.msk.bf16.mxu0 %vm439_vm1, %v3430_v14 }
 0x141   : > { %3118 = vmatmul.mubr.msk.bf16.gmra.mrb[40].mxu0 %vm439_vm1, %v3444_v16 }
 0x142   : > { %3121 = vmatprep.mubr.msk.bf16.mxu0 %vm439_vm1, %v3447_v17 }
 0x149   : > { %3122 = vmatmul.mubr.msk.bf16.gmra.mrb[44].mxu0 %vm439_vm1, %v3457_v18 }
 0x1c6   : > { %v3061_v4 = vpop.f32.mrb[16].mxu1 }
 0x1c7   : > { %v800_v5 = vadd.f32 %v3061_v4, %v3568_v3  ;;  %v791_v6 = vpop.f32.mrb[17].mxu1 }
 0x1c8   : > { %v792_v7 = vadd.f32 %v3568_v3, %v791_v6  ;;  %v3062_v8 = vpop.f32.mrb[18].mxu1 }
 0x1c9   : > { %v803_v9 = vadd.f32 %v3062_v8, %v3568_v3  ;;  %v794_v11 = vpop.f32.mrb[19].mxu1  ;;  %v920_v13 = vmax.f32 %v800_v5, 0.0 }
 0x1ca   : > { %v795_v12 = vadd.f32 %v3568_v3, %v794_v11  ;;  %v918_v15 = vmax.f32 %v792_v7, 0.0 }
 0x1cb   : > { %v921_v14 = vmax.f32 %v803_v9, 0.0 }
 0x1cc   : > { %v919_v16 = vmax.f32 %v795_v12, 0.0 }
 0x1cd   : > { %v3574_v17 = vpack.c.bf16 %v921_v14, %v920_v13 }
 0x1ce   : > { %v3576_v18 = vpack.c.bf16 %v919_v16, %v918_v15  ;;  %v3065_v38 = vpop.f32.mrb[20].mxu1 }
 0x1cf   : > { %v816_v39 = vadd.f32 %v3065_v38, %v3568_v3  ;;  %v807_v40 = vpop.f32.mrb[21].mxu1 }
 0x1d0   : > { %v808_v41 = vadd.f32 %v3568_v3, %v807_v40  ;;  %v3066_v42 = vpop.f32.mrb[22].mxu1  ;;  %1364 = vrot.lane.b32.xlu0 %v3576_v18, %s3308_s24  ;;  %3127 = vmatprep.mubr.msk.bf16.mxu1 %vm704_vm2, %v3576_v18 }
 0x1d1   : > { %v819_v43 = vadd.f32 %v3066_v42, %v3568_v3  ;;  %v810_v44 = vpop.f32.mrb[23].mxu1  ;;  %3128 = vmatmul.mubr.msk.bf16.vlgmr.msra.gmra.mrb[48].mxu1 %vm704_vm2, %v3574_v17  ;;  %v924_v46 = vmax.f32 %v816_v39, 0.0 }
 0x1d2   : > { %v811_v45 = vadd.f32 %v3568_v3, %v810_v44  ;;  %3194 = vmatpush3.bf16.msra.mxu1 %v3525_v59  ;;  %v922_v48 = vmax.f32 %v808_v41, 0.0 }
 0x1d3   : > { %v925_v47 = vmax.f32 %v819_v43, 0.0 }
 0x1d4   : > { %v923_v49 = vmax.f32 %v811_v45, 0.0  ;;  %1366 = vrot.lane.b32.xlu0 %v3574_v17, %s3308_s24 }
 0x1d5   : > { %v3591_v50 = vpack.c.bf16 %v925_v47, %v924_v46 }
 0x1d6   : > { %v3593_v51 = vpack.c.bf16 %v923_v49, %v922_v48  ;;  %v3069_v52 = vpop.f32.mrb[24].mxu1 }
 0x1d7   : > { %v832_v53 = vadd.f32 %v3069_v52, %v3568_v3  ;;  %v823_v54 = vpop.f32.mrb[25].mxu1 }
 0x1d8   : > { %v824_v55 = vadd.f32 %v3568_v3, %v823_v54  ;;  %v3070_v56 = vpop.f32.mrb[26].mxu1  ;;  %1368 = vrot.lane.b32.xlu1 %v3593_v51, %s3308_s24  ;;  %3131 = vmatprep.mubr.msk.bf16.mxu1 %vm704_vm2, %v3593_v51 }
 0x1d9   : > { %v835_v57 = vadd.f32 %v3070_v56, %v3568_v3  ;;  %v826_v58 = vpop.f32.mrb[27].mxu1  ;;  %3132 = vmatmul.mubr.msk.bf16.gmra.mrb[52].mxu1 %vm704_vm2, %v3591_v50  ;;  %v928_v61 = vmax.f32 %v832_v53, 0.0 }
 0x1da   : > { %v827_v60 = vadd.f32 %v3568_v3, %v826_v58  ;;  %v926_v0 = vmax.f32 %v824_v55, 0.0 }
 0x1db   : > { %v929_v63 = vmax.f32 %v835_v57, 0.0 }
 0x1dc   : > { %v927_v1 = vmax.f32 %v827_v60, 0.0  ;;  %1370 = vrot.lane.b32.xlu1 %v3591_v50, %s3308_s24 }
 0x1dd   : > { %v3607_v2 = vpack.c.bf16 %v929_v63, %v928_v61 }
 0x1de   : > { %v3609_v10 = vpack.c.bf16 %v927_v1, %v926_v0  ;;  %v3073_v20 = vpop.f32.mrb[28].mxu1 }
 0x1df   : > { %v848_v21 = vadd.f32 %v3073_v20, %v3568_v3  ;;  %v839_v22 = vpop.f32.mrb[29].mxu1 }
 0x1e0   : > { %v840_v23 = vadd.f32 %v3568_v3, %v839_v22  ;;  %v3074_v24 = vpop.f32.mrb[30].mxu1  ;;  %1374 = vrot.lane.b32.xlu1 %v3607_v2, %s3308_s24  ;;  %1372 = vrot.lane.b32.xlu0 %v3609_v10, %s3308_s24 }
 0x1e1   : > { %v851_v25 = vadd.f32 %v3074_v24, %v3568_v3  ;;  %3135 = vmatprep.mubr.msk.bf16.mxu1 %vm704_vm2, %v3609_v10  ;;  %v842_v26 = vpop.f32.mrb[31].mxu1  ;;  %v932_v28 = vmax.f32 %v848_v21, 0.0 }
 0x1e2   : > { %v843_v27 = vadd.f32 %v3568_v3, %v842_v26  ;;  %3136 = vmatmul.mubr.msk.bf16.gmra.mrb[56].mxu1 %vm704_vm2, %v3607_v2  ;;  %v930_v30 = vmax.f32 %v840_v23, 0.0 }
 0x1e3   : > { %v933_v29 = vmax.f32 %v851_v25, 0.0 }
 0x1e4   : > { %v931_v31 = vmax.f32 %v843_v27, 0.0 }
 0x1e5   : > { %v3623_v32 = vpack.c.bf16 %v933_v29, %v932_v28 }
 0x1e6   : > { %v3625_v33 = vpack.c.bf16 %v931_v31, %v930_v30  ;;  %v3077_v34 = vpop.f32.mrb[32].mxu1 }
 0x1e7   : > { %v864_v35 = vadd.f32 %v3077_v34, %v3568_v3  ;;  %v855_v36 = vpop.f32.mrb[33].mxu1  ;;  %1378 = vrot.lane.b32.xlu1 %v3623_v32, %s3308_s24 }
 0x1e8   : > { %v856_v37 = vadd.f32 %v3568_v3, %v855_v36  ;;  %v3078_v19 = vpop.f32.mrb[34].mxu1  ;;  %1376 = vrot.lane.b32.xlu0 %v3625_v33, %s3308_s24  ;;  %3139 = vmatprep.mubr.msk.bf16.mxu1 %vm704_vm2, %v3625_v33 }
 0x1e9   : > { %v867_v62 = vadd.f32 %v3078_v19, %v3568_v3  ;;  %v858_v4 = vpop.f32.mrb[35].mxu1  ;;  %v936_v6 = vmax.f32 %v864_v35, 0.0 }
 0x1ea   : > { %v859_v5 = vadd.f32 %v3568_v3, %v858_v4  ;;  %3140 = vmatmul.mubr.msk.bf16.gmra.mrb[60].mxu1 %vm704_vm2, %v3623_v32  ;;  %v934_v8 = vmax.f32 %v856_v37, 0.0 }
 0x1eb   : > { %v937_v7 = vmax.f32 %v867_v62, 0.0 }
 0x1ec   : > { %v935_v9 = vmax.f32 %v859_v5, 0.0 }
 0x1ed   : > { %v3639_v11 = vpack.c.bf16 %v937_v7, %v936_v6 }
 0x1ee   : > { %v3641_v12 = vpack.c.bf16 %v935_v9, %v934_v8  ;;  %v3081_v13 = vpop.f32.mrb[36].mxu1 }
 0x1ef   : > { %v880_v14 = vadd.f32 %v3081_v13, %v3568_v3  ;;  %v871_v15 = vpop.f32.mrb[37].mxu1  ;;  %1382 = vrot.lane.b32.xlu1 %v3639_v11, %s3308_s24 }
 0x1f0   : > { %v872_v16 = vadd.f32 %v3568_v3, %v871_v15  ;;  %v3082_v38 = vpop.f32.mrb[38].mxu1  ;;  %1380 = vrot.lane.b32.xlu0 %v3641_v12, %s3308_s24  ;;  %3143 = vmatprep.mubr.msk.bf16.mxu1 %vm704_vm2, %v3641_v12 }
 0x1f1   : > { %v883_v39 = vadd.f32 %v3082_v38, %v3568_v3  ;;  %v874_v40 = vpop.f32.mrb[39].mxu1  ;;  %v940_v42 = vmax.f32 %v880_v14, 0.0 }
 0x1f2   : > { %v875_v41 = vadd.f32 %v3568_v3, %v874_v40  ;;  %3144 = vmatmul.mubr.msk.bf16.gmra.mrb[64].mxu1 %vm704_vm2, %v3639_v11  ;;  %v938_v44 = vmax.f32 %v872_v16, 0.0 }
 0x1f3   : > { %v941_v43 = vmax.f32 %v883_v39, 0.0 }
 0x1f4   : > { %v939_v45 = vmax.f32 %v875_v41, 0.0 }
 0x1f5   : > { %v3655_v46 = vpack.c.bf16 %v941_v43, %v940_v42 }
 0x1f6   : > { %v3657_v47 = vpack.c.bf16 %v939_v45, %v938_v44  ;;  %v3085_v48 = vpop.f32.mrb[40].mxu1 }
 0x1f7   : > { %v896_v49 = vadd.f32 %v3085_v48, %v3568_v3  ;;  %v887_v52 = vpop.f32.mrb[41].mxu1  ;;  %1386 = vrot.lane.b32.xlu1 %v3655_v46, %s3308_s24 }
 0x1f8   : > { %v888_v53 = vadd.f32 %v3568_v3, %v887_v52  ;;  %v3086_v54 = vpop.f32.mrb[42].mxu1  ;;  %1384 = vrot.lane.b32.xlu0 %v3657_v47, %s3308_s24  ;;  %3147 = vmatprep.mubr.msk.bf16.mxu1 %vm704_vm2, %v3657_v47 }
 0x1f9   : > { %v899_v55 = vadd.f32 %v3086_v54, %v3568_v3  ;;  %v890_v56 = vpop.f32.mrb[43].mxu1  ;;  %v944_v58 = vmax.f32 %v896_v49, 0.0 }
 0x1fa   : > { %v891_v57 = vadd.f32 %v3568_v3, %v890_v56  ;;  %3148 = vmatmul.mubr.msk.bf16.gmra.mrb[68].mxu1 %vm704_vm2, %v3655_v46  ;;  %v942_v61 = vmax.f32 %v888_v53, 0.0 }
 0x1fb   : > { %v945_v60 = vmax.f32 %v899_v55, 0.0 }
 0x1fc   : > { %v943_v63 = vmax.f32 %v891_v57, 0.0 }
 0x1fd   : > { %v963_v0 = vpack.c.bf16 %v945_v60, %v944_v58 }
 0x1fe   : > { %v962_v1 = vpack.c.bf16 %v943_v63, %v942_v61  ;;  %v3089_v20 = vpop.f32.mrb[44].mxu1 }
 0x1ff   : > { %v912_v21 = vadd.f32 %v3089_v20, %v3568_v3  ;;  %v903_v22 = vpop.f32.mrb[45].mxu1  ;;  %1390 = vrot.lane.b32.xlu1 %v963_v0, %s3308_s24 }
 0x200   : > { %v904_v23 = vadd.f32 %v3568_v3, %v903_v22  ;;  %v3090_v24 = vpop.f32.mrb[46].mxu1  ;;  %1388 = vrot.lane.b32.xlu0 %v962_v1, %s3308_s24  ;;  %3151 = vmatprep.mubr.msk.bf16.mxu1 %vm704_vm2, %v962_v1 }
 0x201   : > { %v915_v25 = vadd.f32 %v3090_v24, %v3568_v3  ;;  %v906_v26 = vpop.f32.mrb[47].mxu1  ;;  %v948_v28 = vmax.f32 %v912_v21, 0.0 }
 0x202   : > { %v907_v27 = vadd.f32 %v3568_v3, %v906_v26  ;;  %3152 = vmatmul.mubr.msk.bf16.gmra.mrb[72].mxu1 %vm704_vm2, %v963_v0  ;;  %v946_v30 = vmax.f32 %v904_v23, 0.0 }
 0x203   : > { %v949_v29 = vmax.f32 %v915_v25, 0.0 }
 0x204   : > { %v947_v31 = vmax.f32 %v907_v27, 0.0 }
 0x205   : > { %v965_v34 = vpack.c.bf16 %v949_v29, %v948_v28 }
 0x206   : > { %v964_v35 = vpack.c.bf16 %v947_v31, %v946_v30 }
 0x207   : > { %1394 = vrot.lane.b32.xlu1 %v965_v34, %s3308_s24 }
 0x208   : > { %1392 = vrot.lane.b32.xlu0 %v964_v35, %s3308_s24  ;;  %3155 = vmatprep.mubr.msk.bf16.mxu1 %vm704_vm2, %v964_v35 }
 0x20a   : > { %3156 = vmatmul.mubr.msk.bf16.gmra.mrb[76].mxu1 %vm704_vm2, %v965_v34 }
 0x20b   : > { %1607 = vrot.lane.b32.xlu1 %v3574_v17, %s3309_s25 }
 0x20c   : > { %1605 = vrot.lane.b32.xlu0 %v3576_v18, %s3309_s25 }
 0x20f   : > { %1848 = vrot.lane.b32.xlu1 %v3574_v17, %s3310_s26 }
 0x210   : > { %1846 = vrot.lane.b32.xlu0 %v3576_v18, %s3310_s26 }
 0x213   : > { %1611 = vrot.lane.b32.xlu1 %v3591_v50, %s3309_s25 }
 0x214   : > { %1609 = vrot.lane.b32.xlu0 %v3593_v51, %s3309_s25 }
 0x217   : > { %1852 = vrot.lane.b32.xlu1 %v3591_v50, %s3310_s26 }
 0x218   : > { %1850 = vrot.lane.b32.xlu0 %v3593_v51, %s3310_s26 }
 0x21b   : > { %1615 = vrot.lane.b32.xlu1 %v3607_v2, %s3309_s25 }
 0x21c   : > { %1613 = vrot.lane.b32.xlu0 %v3609_v10, %s3309_s25 }
 0x21f   : > { %1856 = vrot.lane.b32.xlu1 %v3607_v2, %s3310_s26 }
 0x220   : > { %1854 = vrot.lane.b32.xlu0 %v3609_v10, %s3310_s26 }
 0x223   : > { %1619 = vrot.lane.b32.xlu1 %v3623_v32, %s3309_s25 }
 0x224   : > { %1617 = vrot.lane.b32.xlu0 %v3625_v33, %s3309_s25 }
 0x227   : > { %1860 = vrot.lane.b32.xlu1 %v3623_v32, %s3310_s26 }
 0x228   : > { %1858 = vrot.lane.b32.xlu0 %v3625_v33, %s3310_s26  ;;  %v3748_v33 = vpop.f32.mrb[16].mxu0 }
 0x229   : > { %4561 = vst [vmem:[#allocation2_spill] sm:$0xff] %v3748_v33 }
 0x22b   : > { %1623 = vrot.lane.b32.xlu1 %v3639_v11, %s3309_s25 }
 0x22c   : > { %1621 = vrot.lane.b32.xlu0 %v3641_v12, %s3309_s25 }
 0x22f   : > { %1864 = vrot.lane.b32.xlu1 %v3639_v11, %s3310_s26 }
 0x230   : > { %1862 = vrot.lane.b32.xlu0 %v3641_v12, %s3310_s26 }
 0x233   : > { %1627 = vrot.lane.b32.xlu1 %v3655_v46, %s3309_s25 }
 0x234   : > { %1625 = vrot.lane.b32.xlu0 %v3657_v47, %s3309_s25 }
 0x237   : > { %1868 = vrot.lane.b32.xlu1 %v3655_v46, %s3310_s26 }
 0x238   : > { %1866 = vrot.lane.b32.xlu0 %v3657_v47, %s3310_s26 }
 0x23b   : > { %1631 = vrot.lane.b32.xlu1 %v963_v0, %s3309_s25 }
 0x23c   : > { %1629 = vrot.lane.b32.xlu0 %v962_v1, %s3309_s25 }
 0x23f   : > { %1872 = vrot.lane.b32.xlu1 %v963_v0, %s3310_s26 }
 0x240   : > { %1870 = vrot.lane.b32.xlu0 %v962_v1, %s3310_s26 }
 0x242   : > { %v1365_v3 = vpop.permute.xlu0 %1364 }
 0x243   : > { %1635 = vrot.lane.b32.xlu1 %v965_v34, %s3309_s25  ;;  %3161 = vmatprep.mubr.msk.bf16.mxu0 %vm704_vm2, %v1365_v3 }
 0x244   : > { %1633 = vrot.lane.b32.xlu0 %v964_v35, %s3309_s25 }
 0x246   : > { %v1367_v17 = vpop.permute.xlu0 %1366 }
 0x247   : > { %1876 = vrot.lane.b32.xlu1 %v965_v34, %s3310_s26  ;;  %3162 = vmatmul.mubr.msk.bf16.vlgmr.msra.gmra.mrb[48].mxu0 %vm704_vm2, %v1367_v17 }
 0x248   : > { %1874 = vrot.lane.b32.xlu0 %v964_v35, %s3310_s26  ;;  %3228 = vmatpush3.bf16.msra.mxu0 %v3525_v59  ;;  %v3750_v59 = vpop.f32.mrb[17].mxu0 }
 0x249   : > { %4562 = vst [vmem:[#allocation3_spill] sm:$0xff] %v3750_v59  ;;  %v3752_v37 = vpop.f32.mrb[18].mxu0 }
 0x24a   : > { %v1369_v18 = vpop.permute.xlu1 %1368  ;;  %4563 = vst [vmem:[#allocation4_spill] sm:$0xff] %v3752_v37  ;;  %v3755_v19 = vpop.f32.mrb[19].mxu0 }
 0x24b   : > { %3165 = vmatprep.mubr.msk.bf16.mxu0 %vm704_vm2, %v1369_v18  ;;  %4564 = vst [vmem:[#allocation5_spill] sm:$0xff] %v3755_v19  ;;  %v3757_v62 = vpop.f32.mrb[20].mxu0 }
 0x24c   : > { %4565 = vst [vmem:[#allocation6_spill] sm:$0xff] %v3757_v62  ;;  %v3759_v4 = vpop.f32.mrb[21].mxu0 }
 0x24d   : > { %4566 = vst [vmem:[#allocation7_spill] sm:$0xff] %v3759_v4  ;;  %v3761_v6 = vpop.f32.mrb[22].mxu0 }
 0x24e   : > { %v1371_v50 = vpop.permute.xlu1 %1370  ;;  %4567 = vst [vmem:[#allocation8_spill] sm:$0xff] %v3761_v6  ;;  %v3764_v7 = vpop.f32.mrb[23].mxu0 }
 0x24f   : > { %3166 = vmatmul.mubr.msk.bf16.gmra.mrb[52].mxu0 %vm704_vm2, %v1371_v50  ;;  %4568 = vst [vmem:[#allocation9_spill] sm:$0xff] %v3764_v7  ;;  %v3767_v9 = vpop.f32.mrb[24].mxu0 }
 0x250   : > { %4569 = vst [vmem:[#allocation10_spill] sm:$0xff] %v3767_v9  ;;  %v3769_v11 = vpop.f32.mrb[25].mxu0 }
 0x251   : > { %4570 = vst [vmem:[#allocation11_spill] sm:$0xff] %v3769_v11  ;;  %v3771_v12 = vpop.f32.mrb[26].mxu0 }
 0x252   : > { %v1373_v51 = vpop.permute.xlu0 %1372  ;;  %v1375_v2 = vpop.permute.xlu1 %1374  ;;  %4571 = vst [vmem:[#allocation12_spill] sm:$0xff] %v3771_v12 }
 0x253   : > { %3169 = vmatprep.mubr.msk.bf16.mxu0 %vm704_vm2, %v1373_v51  ;;  %v3773_v14 = vpop.f32.mrb[27].mxu0 }
 0x254   : > { %4572 = vst [vmem:[#allocation13_spill] sm:$0xff] %v3773_v14  ;;  %v3777_v16 = vpop.f32.mrb[28].mxu0 }
 0x255   : > { %4573 = vst [vmem:[#allocation14_spill] sm:$0xff] %v3777_v16  ;;  %v3779_v38 = vpop.f32.mrb[29].mxu0 }
 0x256   : > { %4574 = vst [vmem:[#allocation15_spill] sm:$0xff] %v3779_v38  ;;  %v3781_v40 = vpop.f32.mrb[30].mxu0 }
 0x257   : > { %3170 = vmatmul.mubr.msk.bf16.gmra.mrb[56].mxu0 %vm704_vm2, %v1375_v2  ;;  %4575 = vst [vmem:[#allocation16_spill] sm:$0xff] %v3781_v40  ;;  %v3783_v41 = vpop.f32.mrb[31].mxu0 }
 0x258   : > { %4576 = vst [vmem:[#allocation17_spill] sm:$0xff] %v3783_v41  ;;  %v3787_v44 = vpop.f32.mrb[32].mxu0 }
 0x259   : > { %v1379_v32 = vpop.permute.xlu1 %1378  ;;  %4577 = vst [vmem:[#allocation18_spill] sm:$0xff] %v3787_v44  ;;  %v3789_v45 = vpop.f32.mrb[33].mxu0 }
 0x25a   : > { %v1377_v10 = vpop.permute.xlu0 %1376  ;;  %4578 = vst [vmem:[#allocation19_spill] sm:$0xff] %v3789_v45  ;;  %v3791_v47 = vpop.f32.mrb[34].mxu0 }
 0x25b   : > { %3173 = vmatprep.mubr.msk.bf16.mxu0 %vm704_vm2, %v1377_v10  ;;  %4579 = vst [vmem:[#allocation20_spill] sm:$0xff] %v3791_v47  ;;  %v3793_v49 = vpop.f32.mrb[35].mxu0 }
 0x25c   : > { %4580 = vst [vmem:[#allocation21_spill] sm:$0xff] %v3793_v49  ;;  %v3799_v54 = vpop.f32.mrb[36].mxu0 }
 0x25d   : > { %4581 = vst [vmem:[#allocation22_spill] sm:$0xff] %v3799_v54  ;;  %v3801_v55 = vpop.f32.mrb[37].mxu0 }
 0x25e   : > { %4582 = vst [vmem:[#allocation23_spill] sm:$0xff] %v3801_v55  ;;  %v3803_v57 = vpop.f32.mrb[38].mxu0 }
 0x25f   : > { %3174 = vmatmul.mubr.msk.bf16.gmra.mrb[60].mxu0 %vm704_vm2, %v1379_v32  ;;  %4583 = vst [vmem:[#allocation24_spill] sm:$0xff] %v3803_v57  ;;  %v3805_v60 = vpop.f32.mrb[39].mxu0 }
 0x260   : > { %4584 = vst [vmem:[#allocation25_spill] sm:$0xff] %v3805_v60  ;;  %v3811_v0 = vpop.f32.mrb[40].mxu0 }
 0x261   : > { %v1383_v5 = vpop.permute.xlu1 %1382  ;;  %4585 = vst [vmem:[#allocation26_spill] sm:$0xff] %v3811_v0  ;;  %v3813_v1 = vpop.f32.mrb[41].mxu0 }
 0x262   : > { %v1381_v36 = vpop.permute.xlu0 %1380  ;;  %4586 = vst [vmem:[#allocation27_spill] sm:$0xff] %v3813_v1  ;;  %v3815_v21 = vpop.f32.mrb[42].mxu0 }
 0x263   : > { %3177 = vmatprep.mubr.msk.bf16.mxu0 %vm704_vm2, %v1381_v36  ;;  %4587 = vst [vmem:[#allocation28_spill] sm:$0xff] %v3815_v21  ;;  %v3817_v23 = vpop.f32.mrb[43].mxu0 }
 0x264   : > { %4588 = vst [vmem:[#allocation29_spill] sm:$0xff] %v3817_v23  ;;  %v3823_v26 = vpop.f32.mrb[44].mxu0 }
 0x265   : > { %4589 = vst [vmem:[#allocation30_spill] sm:$0xff] %v3823_v26  ;;  %v3825_v27 = vpop.f32.mrb[45].mxu0 }
 0x266   : > { %4590 = vst [vmem:[#allocation31_spill] sm:$0xff] %v3825_v27  ;;  %v3827_v29 = vpop.f32.mrb[46].mxu0 }
 0x267   : > { %3178 = vmatmul.mubr.msk.bf16.gmra.mrb[64].mxu0 %vm704_vm2, %v1383_v5  ;;  %4591 = vst [vmem:[#allocation32_spill] sm:$0xff] %v3827_v29  ;;  %v3829_v31 = vpop.f32.mrb[47].mxu0 }
 0x268   : > { %4592 = vst [vmem:[#allocation33_spill] sm:$0xff] %v3829_v31 }
 0x269   : > { %v1387_v13 = vpop.permute.xlu1 %1386 }
 0x26a   : > { %v1385_v8 = vpop.permute.xlu0 %1384 }
 0x26b   : > { %3181 = vmatprep.mubr.msk.bf16.mxu0 %vm704_vm2, %v1385_v8 }
 0x26f   : > { %3182 = vmatmul.mubr.msk.bf16.gmra.mrb[68].mxu0 %vm704_vm2, %v1387_v13 }
 0x271   : > { %v1391_v39 = vpop.permute.xlu1 %1390 }
 0x272   : > { %v1389_v15 = vpop.permute.xlu0 %1388 }
 0x273   : > { %3185 = vmatprep.mubr.msk.bf16.mxu0 %vm704_vm2, %v1389_v15 }
 0x277   : > { %3186 = vmatmul.mubr.msk.bf16.gmra.mrb[72].mxu0 %vm704_vm2, %v1391_v39 }
 0x279   : > { %v1395_v42 = vpop.permute.xlu1 %1394 }
 0x27a   : > { %v1393_v43 = vpop.permute.xlu0 %1392 }
 0x27b   : > { %3189 = vmatprep.mubr.msk.bf16.mxu0 %vm704_vm2, %v1393_v43 }
 0x27d   : > { %v1608_v46 = vpop.permute.xlu1 %1607 }
 0x27e   : > { %v1606_v48 = vpop.permute.xlu0 %1605 }
 0x27f   : > { %3190 = vmatmul.mubr.msk.bf16.gmra.mrb[76].mxu0 %vm704_vm2, %v1395_v42  ;;  %3195 = vmatprep.mubr.msk.bf16.mxu1 %vm704_vm2, %v1606_v48 }
 0x280   : > { %3196 = vmatmul.mubr.msk.bf16.vlgmr.msra.gmra.mrb[80].mxu1 %vm704_vm2, %v1608_v46 }
 0x281   : > { %v1849_v52 = vpop.permute.xlu1 %1848 }
 0x282   : > { %v1847_v53 = vpop.permute.xlu0 %1846 }
 0x283   : > { %3229 = vmatprep.mubr.msk.bf16.mxu0 %vm704_vm2, %v1847_v53 }
 0x285   : > { %v1612_v56 = vpop.permute.xlu1 %1611 }
 0x286   : > { %v1610_v58 = vpop.permute.xlu0 %1609 }
 0x287   : > { %3199 = vmatprep.mubr.msk.bf16.mxu1 %vm704_vm2, %v1610_v58  ;;  %3230 = vmatmul.mubr.msk.bf16.vlgmr.msra.gmra.mrb[80].mxu0 %vm704_vm2, %v1849_v52 }
 0x288   : > { %3200 = vmatmul.mubr.msk.bf16.gmra.mrb[84].mxu1 %vm704_vm2, %v1612_v56 }
 0x289   : > { %v1853_v61 = vpop.permute.xlu1 %1852 }
 0x28a   : > { %v1851_v63 = vpop.permute.xlu0 %1850 }
 0x28b   : > { %3233 = vmatprep.mubr.msk.bf16.mxu0 %vm704_vm2, %v1851_v63 }
 0x28d   : > { %v1616_v20 = vpop.permute.xlu1 %1615 }
 0x28e   : > { %v1614_v22 = vpop.permute.xlu0 %1613 }
 0x28f   : > { %3203 = vmatprep.mubr.msk.bf16.mxu1 %vm704_vm2, %v1614_v22  ;;  %3234 = vmatmul.mubr.msk.bf16.gmra.mrb[84].mxu0 %vm704_vm2, %v1853_v61 }
 0x290   : > { %3204 = vmatmul.mubr.msk.bf16.gmra.mrb[88].mxu1 %vm704_vm2, %v1616_v20 }
 0x291   : > { %v1857_v24 = vpop.permute.xlu1 %1856 }
 0x292   : > { %v1855_v25 = vpop.permute.xlu0 %1854 }
 0x293   : > { %3237 = vmatprep.mubr.msk.bf16.mxu0 %vm704_vm2, %v1855_v25 }
 0x295   : > { %v1620_v28 = vpop.permute.xlu1 %1619 }
 0x296   : > { %v1618_v30 = vpop.permute.xlu0 %1617 }
 0x297   : > { %3207 = vmatprep.mubr.msk.bf16.mxu1 %vm704_vm2, %v1618_v30  ;;  %3238 = vmatmul.mubr.msk.bf16.gmra.mrb[88].mxu0 %vm704_vm2, %v1857_v24 }
 0x298   : > { %3208 = vmatmul.mubr.msk.bf16.gmra.mrb[92].mxu1 %vm704_vm2, %v1620_v28 }
 0x299   : > { %v1861_v34 = vpop.permute.xlu1 %1860 }
 0x29a   : > { %v1859_v35 = vpop.permute.xlu0 %1858 }
 0x29b   : > { %3241 = vmatprep.mubr.msk.bf16.mxu0 %vm704_vm2, %v1859_v35 }
 0x29d   : > { %v1624_v3 = vpop.permute.xlu1 %1623 }
 0x29e   : > { %v1622_v17 = vpop.permute.xlu0 %1621 }
 0x29f   : > { %3211 = vmatprep.mubr.msk.bf16.mxu1 %vm704_vm2, %v1622_v17  ;;  %3242 = vmatmul.mubr.msk.bf16.gmra.mrb[92].mxu0 %vm704_vm2, %v1861_v34 }
 0x2a0   : > { %3212 = vmatmul.mubr.msk.bf16.gmra.mrb[96].mxu1 %vm704_vm2, %v1624_v3 }
 0x2a1   : > { %v1865_v18 = vpop.permute.xlu1 %1864 }
 0x2a2   : > { %v1863_v50 = vpop.permute.xlu0 %1862 }
 0x2a3   : > { %3245 = vmatprep.mubr.msk.bf16.mxu0 %vm704_vm2, %v1863_v50 }
 0x2a4   : > { %v3839_v51 = vpop.f32.mrb[48].mxu1 }
 0x2a5   : > { %v1628_v2 = vpop.permute.xlu1 %1627  ;;  %v3841_v10 = vpop.f32.mrb[49].mxu1 }
 0x2a6   : > { %v1626_v32 = vpop.permute.xlu0 %1625  ;;  %v3843_v36 = vpop.f32.mrb[50].mxu1 }
 0x2a7   : > { %v3845_v5 = vpop.f32.mrb[51].mxu1  ;;  %3215 = vmatprep.mubr.msk.bf16.mxu1 %vm704_vm2, %v1626_v32  ;;  %3246 = vmatmul.mubr.msk.bf16.gmra.mrb[96].mxu0 %vm704_vm2, %v1865_v18 }
 0x2a8   : > { %3216 = vmatmul.mubr.msk.bf16.gmra.mrb[100].mxu1 %vm704_vm2, %v1628_v2 }
 0x2a9   : > { %v1869_v8 = vpop.permute.xlu1 %1868 }
 0x2aa   : > { %v1867_v13 = vpop.permute.xlu0 %1866 }
 0x2ab   : > { %3249 = vmatprep.mubr.msk.bf16.mxu0 %vm704_vm2, %v1867_v13 }
 0x2ac   : > { %v3851_v15 = vpop.f32.mrb[52].mxu1 }
 0x2ad   : > { %v1632_v39 = vpop.permute.xlu1 %1631  ;;  %v3853_v42 = vpop.f32.mrb[53].mxu1 }
 0x2ae   : > { %v1630_v43 = vpop.permute.xlu0 %1629  ;;  %v3855_v46 = vpop.f32.mrb[54].mxu1 }
 0x2af   : > { %v3857_v48 = vpop.f32.mrb[55].mxu1  ;;  %3219 = vmatprep.mubr.msk.bf16.mxu1 %vm704_vm2, %v1630_v43  ;;  %3250 = vmatmul.mubr.msk.bf16.gmra.mrb[100].mxu0 %vm704_vm2, %v1869_v8 }
 0x2b0   : > { %3220 = vmatmul.mubr.msk.bf16.gmra.mrb[104].mxu1 %vm704_vm2, %v1632_v39 }
 0x2b1   : > { %v1873_v52 = vpop.permute.xlu1 %1872 }
 0x2b2   : > { %v1871_v53 = vpop.permute.xlu0 %1870 }
 0x2b3   : > { %3253 = vmatprep.mubr.msk.bf16.mxu0 %vm704_vm2, %v1871_v53 }
 0x2b5   : > { %v3863_v56 = vpop.f32.mrb[56].mxu1  ;;  %v1636_v63 = vpop.permute.xlu1 %1635 }
 0x2b6   : > { %v3865_v58 = vpop.f32.mrb[57].mxu1  ;;  %v1634_v61 = vpop.permute.xlu0 %1633 }
 0x2b7   : > { %4593 = vst [vmem:[#allocation34_spill] sm:$0xff] %v3865_v58  ;;  %v3867_v20 = vpop.f32.mrb[58].mxu1  ;;  %3223 = vmatprep.mubr.msk.bf16.mxu1 %vm704_vm2, %v1634_v61  ;;  %3254 = vmatmul.mubr.msk.bf16.gmra.mrb[104].mxu0 %vm704_vm2, %v1873_v52 }
 0x2b8   : > { %v3871_v22 = vpop.f32.mrb[59].mxu1  ;;  %3224 = vmatmul.mubr.msk.bf16.gmra.mrb[108].mxu1 %vm704_vm2, %v1636_v63 }
 0x2b9   : > { %4594 = vst [vmem:[#allocation35_spill] sm:$0xff] %v3871_v22  ;;  %v1877_v28 = vpop.permute.xlu1 %1876 }
 0x2ba   : > { %v1875_v24 = vpop.permute.xlu0 %1874 }
 0x2bb   : > { %3257 = vmatprep.mubr.msk.bf16.mxu0 %vm704_vm2, %v1875_v24 }
 0x2bd   : > { %v3875_v25 = vpop.f32.mrb[60].mxu1 }
 0x2be   : > { %4595 = vst [vmem:[#allocation36_spill] sm:$0xff] %v3875_v25  ;;  %v3877_v30 = vpop.f32.mrb[61].mxu1 }
 0x2bf   : > { %4596 = vst [vmem:[#allocation37_spill] sm:$0xff] %v3877_v30  ;;  %v3879_v34 = vpop.f32.mrb[62].mxu1  ;;  %3258 = vmatmul.mubr.msk.bf16.gmra.mrb[108].mxu0 %vm704_vm2, %v1877_v28 }
 0x2c0   : > { %4597 = vst [vmem:[#allocation38_spill] sm:$0xff] %v3879_v34  ;;  %v3882_v35 = vpop.f32.mrb[63].mxu1 }
 0x2c1   : > { %4598 = vst [vmem:[#allocation39_spill] sm:$0xff] %v3882_v35 }
 0x2c5   : > { %v3884_v3 = vpop.f32.mrb[64].mxu1 }
 0x2c6   : > { %4599 = vst [vmem:[#allocation40_spill] sm:$0xff] %v3884_v3  ;;  %v3886_v17 = vpop.f32.mrb[65].mxu1 }
 0x2c7   : > { %4600 = vst [vmem:[#allocation41_spill] sm:$0xff] %v3886_v17  ;;  %v3888_v18 = vpop.f32.mrb[66].mxu1 }
 0x2c8   : > { %4601 = vst [vmem:[#allocation42_spill] sm:$0xff] %v3888_v18  ;;  %v3890_v50 = vpop.f32.mrb[67].mxu1 }
 0x2c9   : > { %4602 = vst [vmem:[#allocation43_spill] sm:$0xff] %v3890_v50 }
 0x2cd   : > { %v3892_v2 = vpop.f32.mrb[68].mxu1 }
 0x2ce   : > { %4603 = vst [vmem:[#allocation44_spill] sm:$0xff] %v3892_v2  ;;  %v3894_v32 = vpop.f32.mrb[69].mxu1 }
 0x2cf   : > { %4604 = vst [vmem:[#allocation45_spill] sm:$0xff] %v3894_v32  ;;  %v3896_v8 = vpop.f32.mrb[70].mxu1 }
 0x2d0   : > { %4605 = vst [vmem:[#allocation46_spill] sm:$0xff] %v3896_v8  ;;  %v3898_v13 = vpop.f32.mrb[71].mxu1 }
 0x2d1   : > { %4606 = vst [vmem:[#allocation47_spill] sm:$0xff] %v3898_v13 }
 0x2d5   : > { %v3900_v39 = vpop.f32.mrb[72].mxu1 }
 0x2d6   : > { %4607 = vst [vmem:[#allocation48_spill] sm:$0xff] %v3900_v39  ;;  %v3902_v43 = vpop.f32.mrb[73].mxu1 }
 0x2d7   : > { %4608 = vst [vmem:[#allocation49_spill] sm:$0xff] %v3902_v43  ;;  %v3904_v52 = vpop.f32.mrb[74].mxu1 }
 0x2d8   : > { %4609 = vst [vmem:[#allocation50_spill] sm:$0xff] %v3904_v52  ;;  %v3906_v53 = vpop.f32.mrb[75].mxu1 }
 0x2d9   : > { %4610 = vst [vmem:[#allocation51_spill] sm:$0xff] %v3906_v53 }
 0x2dd   : > { %v3908_v61 = vpop.f32.mrb[76].mxu1 }
 0x2de   : > { %4611 = vst [vmem:[#allocation52_spill] sm:$0xff] %v3908_v61  ;;  %v3910_v63 = vpop.f32.mrb[77].mxu1 }
 0x2df   : > { %4612 = vst [vmem:[#allocation53_spill] sm:$0xff] %v3910_v63  ;;  %v3912_v24 = vpop.f32.mrb[78].mxu1 }
 0x2e0   : > { %4613 = vst [vmem:[#allocation54_spill] sm:$0xff] %v3912_v24  ;;  %v3914_v28 = vpop.f32.mrb[79].mxu1 }
 0x2e1   : > { %4614 = vst [vmem:[#allocation55_spill] sm:$0xff] %v3914_v28 }
 0x31a   : > { %v3163_v29 = vpop.f32.mrb[48].mxu0 }
 0x31b   : > { %2123 = vrot.lane.b32.xlu0 %v3163_v29, %s3311_s28  ;;  %v1478_v26 = vpop.f32.mrb[49].mxu0 }
 0x31c   : > { %v3164_v31 = vpop.f32.mrb[50].mxu0 }
 0x31d   : > { %2125 = vrot.lane.b32.xlu1 %v3164_v31, %s3311_s28  ;;  %v1481_v27 = vpop.f32.mrb[51].mxu0 }
 0x322   : > { %v3167_v23 = vpop.f32.mrb[52].mxu0 }
 0x323   : > { %v1494_v1 = vpop.f32.mrb[53].mxu0 }
 0x324   : > { %v3168_v21 = vpop.f32.mrb[54].mxu0 }
 0x325   : > { %v1497_v0 = vpop.f32.mrb[55].mxu0 }
 0x32a   : > { %v3918_v60 = vpop.f32.mrb[56].mxu0 }
 0x32b   : > { %v3920_v63 = vpop.f32.mrb[57].mxu0 }
 0x32c   : > { %v3922_v55 = vpop.f32.mrb[58].mxu0 }
 0x32d   : > { %v3924_v28 = vpop.f32.mrb[59].mxu0 }
 0x332   : > { %v3926_v57 = vpop.f32.mrb[60].mxu0 }
 0x333   : > { %v3928_v29 = vpop.f32.mrb[61].mxu0 }
 0x334   : > { %v3930_v54 = vpop.f32.mrb[62].mxu0 }
 0x335   : > { %v3932_v31 = vpop.f32.mrb[63].mxu0 }
 0x33a   : > { %v3934_v49 = vpop.f32.mrb[64].mxu0 }
 0x33b   : > { %v3936_v45 = vpop.f32.mrb[65].mxu0 }
 0x33c   : > { %v3938_v47 = vpop.f32.mrb[66].mxu0 }
 0x33d   : > { %v3940_v44 = vpop.f32.mrb[67].mxu0 }
 0x342   : > { %v3942_v41 = vpop.f32.mrb[68].mxu0 }
 0x343   : > { %v3944_v38 = vpop.f32.mrb[69].mxu0 }
 0x344   : > { %v3946_v40 = vpop.f32.mrb[70].mxu0 }
 0x345   : > { %v3948_v16 = vpop.f32.mrb[71].mxu0 }
 0x34a   : > { %v3950_v14 = vpop.f32.mrb[72].mxu0 }
 0x34b   : > { %v3952_v11 = vpop.f32.mrb[73].mxu0 }
 0x34c   : > { %v3954_v12 = vpop.f32.mrb[74].mxu0 }
 0x34d   : > { %v3956_v9 = vpop.f32.mrb[75].mxu0 }
 0x352   : > { %v3958_v7 = vpop.f32.mrb[76].mxu0 }
 0x353   : > { %v3960_v4 = vpop.f32.mrb[77].mxu0  ;;  %v3197_v6 = vpop.f32.mrb[80].mxu1 }
 0x354   : > { %v3962_v62 = vpop.f32.mrb[78].mxu0  ;;  %2251 = vrot.lane.b32.xlu0 %v3197_v6, %s3312_s29  ;;  %v1719_v19 = vpop.f32.mrb[81].mxu1 }
 0x355   : > { %v3965_v59 = vpop.f32.mrb[79].mxu0  ;;  %v3198_v37 = vpop.f32.mrb[82].mxu1 }
 0x356   : > { %2253 = vrot.lane.b32.xlu1 %v3198_v37, %s3312_s29  ;;  %v1722_v33 = vpop.f32.mrb[83].mxu1 }
 0x358   : > { %2119 = vrot.lane.b32.xlu0 %v1478_v26, %s3311_s28 }
 0x35a   : > { %v3969_v24 = vpop.f32.mrb[80].mxu0  ;;  %2121 = vrot.lane.b32.xlu1 %v1481_v27, %s3311_s28 }
 0x35b   : > { %v3201_v61 = vpop.f32.mrb[84].mxu1  ;;  %v3972_v53 = vpop.f32.mrb[81].mxu0 }
 0x35c   : > { %v3974_v43 = vpop.f32.mrb[82].mxu0  ;;  %2247 = vrot.lane.b32.xlu0 %v1719_v19, %s3312_s29  ;;  %v1735_v6 = vpop.f32.mrb[85].mxu1 }
 0x35d   : > { %v3202_v52 = vpop.f32.mrb[86].mxu1  ;;  %v3977_v39 = vpop.f32.mrb[83].mxu0 }
 0x35e   : > { %2249 = vrot.lane.b32.xlu1 %v1722_v33, %s3312_s29  ;;  %v1738_v37 = vpop.f32.mrb[87].mxu1 }
 0x360   : > { %2131 = vrot.lane.b32.xlu0 %v3167_v23, %s3311_s28 }
 0x362   : > { %v3981_v26 = vpop.f32.mrb[84].mxu0  ;;  %2133 = vrot.lane.b32.xlu1 %v3168_v21, %s3311_s28 }
 0x363   : > { %v3205_v27 = vpop.f32.mrb[88].mxu1  ;;  %v3984_v13 = vpop.f32.mrb[85].mxu0 }
 0x364   : > { %v3986_v32 = vpop.f32.mrb[86].mxu0  ;;  %2259 = vrot.lane.b32.xlu0 %v3201_v61, %s3312_s29  ;;  %v1751_v19 = vpop.f32.mrb[89].mxu1 }
 0x365   : > { %v3206_v8 = vpop.f32.mrb[90].mxu1  ;;  %v3989_v2 = vpop.f32.mrb[87].mxu0 }
 0x366   : > { %2261 = vrot.lane.b32.xlu1 %v3202_v52, %s3312_s29  ;;  %v1754_v33 = vpop.f32.mrb[91].mxu1 }
 0x368   : > { %2127 = vrot.lane.b32.xlu0 %v1494_v1, %s3311_s28 }
 0x36a   : > { %v3993_v23 = vpop.f32.mrb[88].mxu0  ;;  %2129 = vrot.lane.b32.xlu1 %v1497_v0, %s3311_s28 }
 0x36b   : > { %v3209_v21 = vpop.f32.mrb[92].mxu1  ;;  %v3996_v50 = vpop.f32.mrb[89].mxu0 }
 0x36c   : > { %v3998_v17 = vpop.f32.mrb[90].mxu0  ;;  %2255 = vrot.lane.b32.xlu0 %v1735_v6, %s3312_s29  ;;  %v1767_v61 = vpop.f32.mrb[93].mxu1 }
 0x36d   : > { %v3210_v18 = vpop.f32.mrb[94].mxu1  ;;  %v4001_v3 = vpop.f32.mrb[91].mxu0 }
 0x36e   : > { %2257 = vrot.lane.b32.xlu1 %v1738_v37, %s3312_s29  ;;  %v1770_v52 = vpop.f32.mrb[95].mxu1 }
 0x370   : > { %2139 = vrot.lane.b32.xlu0 %v3918_v60, %s3311_s28 }
 0x372   : > { %v4006_v1 = vpop.f32.mrb[92].mxu0  ;;  %2141 = vrot.lane.b32.xlu1 %v3922_v55, %s3311_s28 }
 0x373   : > { %v3213_v0 = vpop.f32.mrb[96].mxu1  ;;  %v4010_v35 = vpop.f32.mrb[93].mxu0 }
 0x374   : > { %4615 = vst [vmem:[#allocation56_spill] sm:$0xff] %v4010_v35  ;;  %v4012_v30 = vpop.f32.mrb[94].mxu0  ;;  %2267 = vrot.lane.b32.xlu0 %v3205_v27, %s3312_s29  ;;  %v1783_v6 = vpop.f32.mrb[97].mxu1 }
 0x375   : > { %v3214_v34 = vpop.f32.mrb[98].mxu1  ;;  %v4015_v25 = vpop.f32.mrb[95].mxu0 }
 0x376   : > { %4616 = vst [vmem:[#allocation57_spill] sm:$0xff] %v4015_v25  ;;  %2269 = vrot.lane.b32.xlu1 %v3206_v8, %s3312_s29  ;;  %v1786_v37 = vpop.f32.mrb[99].mxu1 }
 0x378   : > { %2135 = vrot.lane.b32.xlu0 %v3920_v63, %s3311_s28 }
 0x37a   : > { %v4020_v60 = vpop.f32.mrb[96].mxu0  ;;  %2137 = vrot.lane.b32.xlu1 %v3924_v28, %s3311_s28 }
 0x37b   : > { %4617 = vst [vmem:[#allocation58_spill] sm:$0xff] %v4020_v60  ;;  %v3217_v55 = vpop.f32.mrb[100].mxu1  ;;  %v4024_v22 = vpop.f32.mrb[97].mxu0 }
 0x37c   : > { %4618 = vst [vmem:[#allocation59_spill] sm:$0xff] %v4024_v22  ;;  %v4026_v35 = vpop.f32.mrb[98].mxu0  ;;  %2263 = vrot.lane.b32.xlu0 %v1751_v19, %s3312_s29  ;;  %v1799_v27 = vpop.f32.mrb[101].mxu1 }
 0x37d   : > { %4619 = vst [vmem:[#allocation60_spill] sm:$0xff] %v4026_v35  ;;  %v3218_v25 = vpop.f32.mrb[102].mxu1  ;;  %v4029_v58 = vpop.f32.mrb[99].mxu0 }
 0x37e   : > { %4620 = vst [vmem:[#allocation61_spill] sm:$0xff] %v4029_v58  ;;  %2265 = vrot.lane.b32.xlu1 %v1754_v33, %s3312_s29  ;;  %v1802_v8 = vpop.f32.mrb[103].mxu1 }
 0x380   : > { %2147 = vrot.lane.b32.xlu0 %v3926_v57, %s3311_s28 }
 0x382   : > { %v4034_v63 = vpop.f32.mrb[100].mxu0  ;;  %2149 = vrot.lane.b32.xlu1 %v3930_v54, %s3311_s28 }
 0x383   : > { %4621 = vst [vmem:[#allocation62_spill] sm:$0xff] %v4034_v63  ;;  %v3221_v28 = vpop.f32.mrb[104].mxu1  ;;  %v4038_v22 = vpop.f32.mrb[101].mxu0 }
 0x384   : > { %4622 = vst [vmem:[#allocation63_spill] sm:$0xff] %v4038_v22  ;;  %v4040_v35 = vpop.f32.mrb[102].mxu0  ;;  %2275 = vrot.lane.b32.xlu0 %v3209_v21, %s3312_s29  ;;  %v1815_v19 = vpop.f32.mrb[105].mxu1 }
 0x385   : > { %4623 = vst [vmem:[#allocation64_spill] sm:$0xff] %v4040_v35  ;;  %v3222_v58 = vpop.f32.mrb[106].mxu1  ;;  %v4043_v60 = vpop.f32.mrb[103].mxu0 }
 0x386   : > { %4624 = vst [vmem:[#allocation65_spill] sm:$0xff] %v4043_v60  ;;  %2277 = vrot.lane.b32.xlu1 %v3210_v18, %s3312_s29  ;;  %v1818_v33 = vpop.f32.mrb[107].mxu1 }
 0x388   : > { %2143 = vrot.lane.b32.xlu0 %v3928_v29, %s3311_s28 }
 0x38a   : > { %v4048_v57 = vpop.f32.mrb[104].mxu0  ;;  %2145 = vrot.lane.b32.xlu1 %v3932_v31, %s3311_s28 }
 0x38b   : > { %4625 = vst [vmem:[#allocation66_spill] sm:$0xff] %v4048_v57  ;;  %v3225_v54 = vpop.f32.mrb[108].mxu1  ;;  %v4052_v22 = vpop.f32.mrb[105].mxu0 }
 0x38c   : > { %4626 = vst [vmem:[#allocation67_spill] sm:$0xff] %v4052_v22  ;;  %v4054_v21 = vpop.f32.mrb[106].mxu0  ;;  %2271 = vrot.lane.b32.xlu0 %v1767_v61, %s3312_s29  ;;  %v1831_v60 = vpop.f32.mrb[109].mxu1 }
 0x38d   : > { %4627 = vst [vmem:[#allocation68_spill] sm:$0xff] %v4054_v21  ;;  %v4057_v35 = vpop.f32.mrb[107].mxu0  ;;  %v2124_v18 = vpop.permute.xlu0 %2123 }
 0x38e   : > { %4628 = vst [vmem:[#allocation69_spill] sm:$0xff] %v4057_v35  ;;  %v2474_v29 = vsel %vm2471_vm3, %v3839_v51, %v2124_v18  ;;  %v3226_v63 = vpop.f32.mrb[110].mxu1  ;;  %2273 = vrot.lane.b32.xlu1 %v1770_v52, %s3312_s29  ;;  %v4631_v52 = vld [vmem:[#allocation35_spill] sm:$0xff] }
 0x38f   : > { %v1834_v57 = vpop.f32.mrb[111].mxu1  ;;  %v2126_v31 = vpop.permute.xlu1 %2125 }
 0x390   : > { %v2475_v22 = vsel %vm2471_vm3, %v3843_v36, %v2126_v31  ;;  %2155 = vrot.lane.b32.xlu0 %v3934_v49, %s3311_s28 }
 0x392   : > { %v4066_v21 = vpop.f32.mrb[108].mxu0  ;;  %2157 = vrot.lane.b32.xlu1 %v3938_v47, %s3311_s28 }
 0x393   : > { %v4070_v61 = vpop.f32.mrb[109].mxu0 }
 0x394   : > { %v4072_v35 = vpop.f32.mrb[110].mxu0  ;;  %2283 = vrot.lane.b32.xlu0 %v3213_v0, %s3312_s29 }
 0x395   : > { %v4075_v51 = vpop.f32.mrb[111].mxu0 }
 0x396   : > { %2285 = vrot.lane.b32.xlu1 %v3214_v34, %s3312_s29 }
 0x398   : > { %2151 = vrot.lane.b32.xlu0 %v3936_v45, %s3311_s28 }
 0x39a   : > { %2153 = vrot.lane.b32.xlu1 %v3940_v44, %s3311_s28 }
 0x39c   : > { %2279 = vrot.lane.b32.xlu0 %v1783_v6, %s3312_s29 }
 0x39e   : > { %2281 = vrot.lane.b32.xlu1 %v1786_v37, %s3312_s29 }
 0x3a0   : > { %2163 = vrot.lane.b32.xlu0 %v3942_v41, %s3311_s28 }
 0x3a2   : > { %2165 = vrot.lane.b32.xlu1 %v3946_v40, %s3311_s28 }
 0x3a4   : > { %2291 = vrot.lane.b32.xlu0 %v3217_v55, %s3312_s29 }
 0x3a6   : > { %2293 = vrot.lane.b32.xlu1 %v3218_v25, %s3312_s29 }
 0x3a8   : > { %2159 = vrot.lane.b32.xlu0 %v3944_v38, %s3311_s28 }
 0x3aa   : > { %2161 = vrot.lane.b32.xlu1 %v3948_v16, %s3311_s28 }
 0x3ac   : > { %2287 = vrot.lane.b32.xlu0 %v1799_v27, %s3312_s29 }
 0x3ae   : > { %2289 = vrot.lane.b32.xlu1 %v1802_v8, %s3312_s29  ;;  %v4634_v8 = vld [vmem:[#allocation60_spill] sm:$0xff] }
 0x3b0   : > { %2171 = vrot.lane.b32.xlu0 %v3950_v14, %s3311_s28 }
 0x3b2   : > { %2173 = vrot.lane.b32.xlu1 %v3954_v12, %s3311_s28 }
 0x3b4   : > { %2299 = vrot.lane.b32.xlu0 %v3221_v28, %s3312_s29 }
 0x3b6   : > { %2301 = vrot.lane.b32.xlu1 %v3222_v58, %s3312_s29 }
 0x3b8   : > { %2167 = vrot.lane.b32.xlu0 %v3952_v11, %s3311_s28 }
 0x3ba   : > { %2169 = vrot.lane.b32.xlu1 %v3956_v9, %s3311_s28 }
 0x3bc   : > { %2295 = vrot.lane.b32.xlu0 %v1815_v19, %s3312_s29 }
 0x3be   : > { %2297 = vrot.lane.b32.xlu1 %v1818_v33, %s3312_s29  ;;  %v4636_v33 = vld [vmem:[#allocation59_spill] sm:$0xff] }
 0x3c0   : > { %2179 = vrot.lane.b32.xlu0 %v3958_v7, %s3311_s28 }
 0x3c2   : > { %2181 = vrot.lane.b32.xlu1 %v3962_v62, %s3311_s28 }
 0x3c4   : > { %2307 = vrot.lane.b32.xlu0 %v3225_v54, %s3312_s29 }
 0x3c6   : > { %v2252_v12 = vpop.permute.xlu0 %2251  ;;  %2309 = vrot.lane.b32.xlu1 %v3226_v63, %s3312_s29  ;;  %v4635_v63 = vld [vmem:[#allocation36_spill] sm:$0xff] }
 0x3c7   : > { %v4115_v11 = vsel %vm439_vm1, %v2474_v29, %v2252_v12  ;;  %v4638_v29 = vld [vmem:[#allocation61_spill] sm:$0xff] }
 0x3c8   : > { %v2254_v14 = vpop.permute.xlu1 %2253  ;;  %2175 = vrot.lane.b32.xlu0 %v3960_v4, %s3311_s28 }
 0x3c9   : > { %v4120_v9 = vsel %vm439_vm1, %v2475_v22, %v2254_v14  ;;  %v4639_v14 = vld [vmem:[#allocation62_spill] sm:$0xff] }
 0x3ca   : > { %v2120_v16 = vpop.permute.xlu0 %2119  ;;  %2177 = vrot.lane.b32.xlu1 %v3965_v59, %s3311_s28 }
 0x3cb   : > { %v2472_v62 = vsel %vm2471_vm3, %v3841_v10, %v2120_v16 }
 0x3cc   : > { %v2122_v7 = vpop.permute.xlu1 %2121  ;;  %2303 = vrot.lane.b32.xlu0 %v1831_v60, %s3312_s29 }
 0x3cd   : > { %v2473_v38 = vsel %vm2471_vm3, %v3845_v5, %v2122_v7  ;;  %v4640_v7 = vld [vmem:[#allocation64_spill] sm:$0xff] }
 0x3ce   : > { %v2248_v40 = vpop.permute.xlu0 %2247  ;;  %2305 = vrot.lane.b32.xlu1 %v1834_v57, %s3312_s29  ;;  %v4637_v57 = vld [vmem:[#allocation38_spill] sm:$0xff] }
 0x3cf   : > { %v4131_v4 = vsel %vm439_vm1, %v2472_v62, %v2248_v40 }
 0x3d0   : > { %v2250_v41 = vpop.permute.xlu1 %2249  ;;  %2379 = vrot.lane.b32.xlu0 %v3969_v24, %s3313_s30 }
 0x3d1   : > { %v4136_v59 = vsel %vm439_vm1, %v2473_v38, %v2250_v41  ;;  %v4641_v38 = vld [vmem:[#allocation37_spill] sm:$0xff] }
 0x3d2   : > { %v2132_v44 = vpop.permute.xlu0 %2131  ;;  %2381 = vrot.lane.b32.xlu1 %v3974_v43, %s3313_s30 }
 0x3d3   : > { %v2478_v45 = vsel %vm2471_vm3, %v3851_v15, %v2132_v44  ;;  %v4642_v44 = vld [vmem:[#allocation63_spill] sm:$0xff] }
 0x3d4   : > { %v2134_v47 = vpop.permute.xlu1 %2133  ;;  %2375 = vrot.lane.b32.xlu0 %v3972_v53, %s3313_s30 }
 0x3d5   : > { %v2479_v49 = vsel %vm2471_vm3, %v3855_v46, %v2134_v47 }
 0x3d6   : > { %v2260_v10 = vpop.permute.xlu0 %2259  ;;  %2377 = vrot.lane.b32.xlu1 %v3977_v39, %s3313_s30 }
 0x3d7   : > { %v4149_v36 = vsel %vm439_vm1, %v2478_v45, %v2260_v10  ;;  %v4643_v45 = vld [vmem:[#allocation39_spill] sm:$0xff]  ;;  %v4644_v10 = vld [vmem:[#allocation65_spill] sm:$0xff] }
 0x3d8   : > { %v2262_v5 = vpop.permute.xlu1 %2261  ;;  %2387 = vrot.lane.b32.xlu0 %v3981_v26, %s3313_s30 }
 0x3d9   : > { %v4154_v15 = vsel %vm439_vm1, %v2479_v49, %v2262_v5 }
 0x3da   : > { %v2128_v58 = vpop.permute.xlu0 %2127  ;;  %2389 = vrot.lane.b32.xlu1 %v3986_v32, %s3313_s30 }
 0x3db   : > { %v2476_v46 = vsel %vm2471_vm3, %v3853_v42, %v2128_v58 }
 0x3dc   : > { %v2130_v22 = vpop.permute.xlu1 %2129  ;;  %2383 = vrot.lane.b32.xlu0 %v3984_v13, %s3313_s30 }
 0x3dd   : > { %v2477_v25 = vsel %vm2471_vm3, %v3857_v48, %v2130_v22 }
 0x3de   : > { %v2256_v34 = vpop.permute.xlu0 %2255  ;;  %2385 = vrot.lane.b32.xlu1 %v3989_v2, %s3313_s30 }
 0x3df   : > { %v4167_v39 = vsel %vm439_vm1, %v2476_v46, %v2256_v34  ;;  %v4645_v46 = vld [vmem:[#allocation66_spill] sm:$0xff]  ;;  %v4646_v34 = vld [vmem:[#allocation68_spill] sm:$0xff] }
 0x3e0   : > { %v2258_v43 = vpop.permute.xlu1 %2257  ;;  %2395 = vrot.lane.b32.xlu0 %v3993_v23, %s3313_s30 }
 0x3e1   : > { %v4172_v42 = vsel %vm439_vm1, %v2477_v25, %v2258_v43  ;;  %v4647_v43 = vld [vmem:[#allocation40_spill] sm:$0xff] }
 0x3e2   : > { %v2140_v32 = vpop.permute.xlu0 %2139  ;;  %2397 = vrot.lane.b32.xlu1 %v3998_v17, %s3313_s30 }
 0x3e3   : > { %v2482_v48 = vsel %vm2471_vm3, %v3863_v56, %v2140_v32 }
 0x3e4   : > { %v2142_v13 = vpop.permute.xlu1 %2141  ;;  %2391 = vrot.lane.b32.xlu0 %v3996_v50, %s3313_s30  ;;  %v4629_v50 = vld [vmem:[#allocation34_spill] sm:$0xff] }
 0x3e5   : > { %v2483_v2 = vsel %vm2471_vm3, %v3867_v20, %v2142_v13  ;;  %v4648_v13 = vld [vmem:[#allocation67_spill] sm:$0xff] }
 0x3e6   : > { %v2268_v53 = vpop.permute.xlu0 %2267  ;;  %2393 = vrot.lane.b32.xlu1 %v4001_v3, %s3313_s30  ;;  %v4630_v3 = vld [vmem:[#allocation56_spill] sm:$0xff] }
 0x3e7   : > { %v4185_v24 = vsel %vm439_vm1, %v2482_v48, %v2268_v53 }
 0x3e8   : > { %v2270_v26 = vpop.permute.xlu1 %2269  ;;  %2403 = vrot.lane.b32.xlu0 %v4006_v1, %s3313_s30  ;;  %v4632_v1 = vld [vmem:[#allocation57_spill] sm:$0xff] }
 0x3e9   : > { %v4190_v56 = vsel %vm439_vm1, %v2483_v2, %v2270_v26  ;;  %v4649_v2 = vld [vmem:[#allocation42_spill] sm:$0xff] }
 0x3ea   : > { %v2136_v17 = vpop.permute.xlu0 %2135  ;;  %2405 = vrot.lane.b32.xlu1 %v4012_v30, %s3313_s30  ;;  %v4633_v30 = vld [vmem:[#allocation58_spill] sm:$0xff] }
 0x3eb   : > { %v2480_v20 = vsel %vm2471_vm3, %v4629_v50, %v2136_v17  ;;  %v4650_v17 = vld [vmem:[#allocation69_spill] sm:$0xff] }
 0x3ec   : > { %v2138_v23 = vpop.permute.xlu1 %2137  ;;  %2399 = vrot.lane.b32.xlu0 %v4630_v3, %s3313_s30 }
 0x3ed   : > { %v2481_v0 = vsel %vm2471_vm3, %v4631_v52, %v2138_v23  ;;  %v4651_v52 = vld [vmem:[#allocation41_spill] sm:$0xff] }
 0x3ee   : > { %v2264_v6 = vpop.permute.xlu0 %2263  ;;  %2401 = vrot.lane.b32.xlu1 %v4632_v1, %s3313_s30  ;;  %v4652_v1 = vld [vmem:[#allocation43_spill] sm:$0xff] }
 0x3ef   : > { %v4203_v37 = vsel %vm439_vm1, %v2480_v20, %v2264_v6 }
 0x3f0   : > { %v2266_v60 = vpop.permute.xlu1 %2265  ;;  %2411 = vrot.lane.b32.xlu0 %v4633_v30, %s3313_s30 }
 0x3f1   : > { %v4208_v55 = vsel %vm439_vm1, %v2481_v0, %v2266_v60 }
 0x3f2   : > { %v2148_v27 = vpop.permute.xlu0 %2147  ;;  %2413 = vrot.lane.b32.xlu1 %v4634_v8, %s3313_s30 }
 0x3f3   : > { %v2486_v28 = vsel %vm2471_vm3, %v4635_v63, %v2148_v27  ;;  %v4653_v63 = vld [vmem:[#allocation44_spill] sm:$0xff] }
 0x3f4   : > { %v2150_v19 = vpop.permute.xlu1 %2149  ;;  %2407 = vrot.lane.b32.xlu0 %v4636_v33, %s3313_s30 }
 0x3f5   : > { %v2487_v54 = vsel %vm2471_vm3, %v4637_v57, %v2150_v19 }
 0x3f6   : > { %v2276_v18 = vpop.permute.xlu0 %2275  ;;  %2409 = vrot.lane.b32.xlu1 %v4638_v29, %s3313_s30 }
 0x3f7   : > { %v4221_v31 = vsel %vm439_vm1, %v2486_v28, %v2276_v18 }
 0x3f8   : > { %v2278_v12 = vpop.permute.xlu1 %2277  ;;  %2419 = vrot.lane.b32.xlu0 %v4639_v14, %s3313_s30 }
 0x3f9   : > { %v4226_v16 = vsel %vm439_vm1, %v2487_v54, %v2278_v12  ;;  %v4655_v12 = vld [vmem:[#allocation45_spill] sm:$0xff] }
 0x3fa   : > { %v2144_v62 = vpop.permute.xlu0 %2143  ;;  %2421 = vrot.lane.b32.xlu1 %v4640_v7, %s3313_s30  ;;  %v4656_v7 = vld [vmem:[#allocation47_spill] sm:$0xff] }
 0x3fb   : > { %v2484_v40 = vsel %vm2471_vm3, %v4641_v38, %v2144_v62 }
 0x3fc   : > { %v2146_v41 = vpop.permute.xlu1 %2145  ;;  %2415 = vrot.lane.b32.xlu0 %v4642_v44, %s3313_s30 }
 0x3fd   : > { %v2485_v47 = vsel %vm2471_vm3, %v4643_v45, %v2146_v41 }
 0x3fe   : > { %v2272_v49 = vpop.permute.xlu0 %2271  ;;  %2417 = vrot.lane.b32.xlu1 %v4644_v10, %s3313_s30 }
 0x3ff   : > { %v4239_v5 = vsel %vm439_vm1, %v2484_v40, %v2272_v49  ;;  %v4657_v49 = vld [vmem:[#allocation48_spill] sm:$0xff] }
 0x400   : > { %v2274_v58 = vpop.permute.xlu1 %2273  ;;  %2427 = vrot.lane.b32.xlu0 %v4645_v46, %s3313_s30  ;;  %v4658_v46 = vld [vmem:[#allocation50_spill] sm:$0xff] }
 0x401   : > { %v4244_v22 = vsel %vm439_vm1, %v2485_v47, %v2274_v58 }
 0x402   : > { %v2156_v25 = vpop.permute.xlu0 %2155  ;;  %2429 = vrot.lane.b32.xlu1 %v4646_v34, %s3313_s30 }
 0x403   : > { %v2490_v32 = vsel %vm2471_vm3, %v4647_v43, %v2156_v25 }
 0x404   : > { %v2158_v48 = vpop.permute.xlu1 %2157  ;;  %2423 = vrot.lane.b32.xlu0 %v4648_v13, %s3313_s30 }
 0x405   : > { %v2491_v53 = vsel %vm2471_vm3, %v4649_v2, %v2158_v48  ;;  %v4659_v2 = vld [vmem:[#allocation49_spill] sm:$0xff] }
 0x406   : > { %v2284_v26 = vpop.permute.xlu0 %2283  ;;  %2425 = vrot.lane.b32.xlu1 %v4650_v17, %s3313_s30  ;;  %v4660_v17 = vld [vmem:[#allocation51_spill] sm:$0xff] }
 0x407   : > { %v4257_v50 = vsel %vm439_vm1, %v2490_v32, %v2284_v26 }
 0x408   : > { %v2286_v20 = vpop.permute.xlu1 %2285  ;;  %2431 = vrot.lane.b32.xlu0 %v4070_v61, %s3313_s30 }
 0x409   : > { %v4262_v23 = vsel %vm439_vm1, %v2491_v53, %v2286_v20 }
 0x40a   : > { %v2152_v3 = vpop.permute.xlu0 %2151  ;;  %2433 = vrot.lane.b32.xlu1 %v4075_v51, %s3313_s30 }
 0x40b   : > { %v2488_v0 = vsel %vm2471_vm3, %v4651_v52, %v2152_v3 }
 0x40c   : > { %v2154_v6 = vpop.permute.xlu1 %2153  ;;  %2435 = vrot.lane.b32.xlu0 %v4066_v21, %s3313_s30  ;;  %v4654_v21 = vld [vmem:[#allocation46_spill] sm:$0xff] }
 0x40d   : > { %v2489_v60 = vsel %vm2471_vm3, %v4652_v1, %v2154_v6 }
 0x40e   : > { %v2280_v30 = vpop.permute.xlu0 %2279  ;;  %2437 = vrot.lane.b32.xlu1 %v4072_v35, %s3313_s30 }
 0x40f   : > { %v4275_v61 = vsel %vm439_vm1, %v2488_v0, %v2280_v30 }
 0x410   : > { %v2282_v27 = vpop.permute.xlu1 %2281 }
 0x411   : > { %v4278_v51 = vsel %vm439_vm1, %v2489_v60, %v2282_v27  ;;  %v4661_v60 = vld [vmem:[#allocation52_spill] sm:$0xff] }
 0x412   : > { %v2164_v8 = vpop.permute.xlu0 %2163 }
 0x413   : > { %v2494_v28 = vsel %vm2471_vm3, %v4653_v63, %v2164_v8  ;;  %v4662_v8 = vld [vmem:[#allocation54_spill] sm:$0xff] }
 0x414   : > { %v2166_v19 = vpop.permute.xlu1 %2165 }
 0x415   : > { %v2495_v33 = vsel %vm2471_vm3, %v4654_v21, %v2166_v19 }
 0x416   : > { %v2292_v57 = vpop.permute.xlu0 %2291 }
 0x417   : > { %v4285_v54 = vsel %vm439_vm1, %v2494_v28, %v2292_v57 }
 0x418   : > { %v2294_v35 = vpop.permute.xlu1 %2293 }
 0x419   : > { %v4288_v18 = vsel %vm439_vm1, %v2495_v33, %v2294_v35 }
 0x41a   : > { %v2160_v29 = vpop.permute.xlu0 %2159 }
 0x41b   : > { %v2492_v14 = vsel %vm2471_vm3, %v4655_v12, %v2160_v29 }
 0x41c   : > { %v2162_v62 = vpop.permute.xlu1 %2161 }
 0x41d   : > { %v2493_v38 = vsel %vm2471_vm3, %v4656_v7, %v2162_v62  ;;  %v4341_v62 = vld [vmem:[%s4559_s7] ss:$0 sm:$0xff] }
 0x41e   : > { %v2288_v40 = vpop.permute.xlu0 %2287 }
 0x41f   : > { %v4295_v41 = vsel %vm439_vm1, %v2492_v14, %v2288_v40 }
 0x420   : > { %v2290_v44 = vpop.permute.xlu1 %2289 }
 0x421   : > { %v4298_v45 = vsel %vm439_vm1, %v2493_v38, %v2290_v44  ;;  %v4663_v38 = vld [vmem:[#allocation2_spill] sm:$0xff] }
 0x422   : > { %v2172_v47 = vpop.permute.xlu0 %2171 }
 0x423   : > { %v2498_v10 = vsel %vm2471_vm3, %v4657_v49, %v2172_v47 }
 0x424   : > { %v2174_v58 = vpop.permute.xlu1 %2173 }
 0x425   : > { %v2499_v25 = vsel %vm2471_vm3, %v4658_v46, %v2174_v58 }
 0x426   : > { %v2300_v34 = vpop.permute.xlu0 %2299 }
 0x427   : > { %v4305_v43 = vsel %vm439_vm1, %v2498_v10, %v2300_v34  ;;  %v4664_v10 = vld [vmem:[#allocation4_spill] sm:$0xff] }
 0x428   : > { %v2302_v32 = vpop.permute.xlu1 %2301 }
 0x429   : > { %v4308_v48 = vsel %vm439_vm1, %v2499_v25, %v2302_v32 }
 0x42a   : > { %v2168_v13 = vpop.permute.xlu0 %2167 }
 0x42b   : > { %v2496_v53 = vsel %vm2471_vm3, %v4659_v2, %v2168_v13 }
 0x42c   : > { %v2170_v26 = vpop.permute.xlu1 %2169 }
 0x42d   : > { %v2497_v20 = vsel %vm2471_vm3, %v4660_v17, %v2170_v26  ;;  %v4666_v17 = vld [vmem:[#allocation5_spill] sm:$0xff] }
 0x42e   : > { %v2296_v3 = vpop.permute.xlu0 %2295 }
 0x42f   : > { %v4315_v52 = vsel %vm439_vm1, %v2496_v53, %v2296_v3 }
 0x430   : > { %v2298_v0 = vpop.permute.xlu1 %2297 }
 0x431   : > { %v4318_v6 = vsel %vm439_vm1, %v2497_v20, %v2298_v0 }
 0x432   : > { %v2180_v1 = vpop.permute.xlu0 %2179 }
 0x433   : > { %v2502_v30 = vsel %vm2471_vm3, %v4661_v60, %v2180_v1  ;;  %v4667_v60 = vld [vmem:[#allocation6_spill] sm:$0xff] }
 0x434   : > { %v2182_v27 = vpop.permute.xlu1 %2181 }
 0x435   : > { %v2503_v63 = vsel %vm2471_vm3, %v4662_v8, %v2182_v27 }
 0x436   : > { %v2308_v28 = vpop.permute.xlu0 %2307 }
 0x437   : > { %v4325_v19 = vsel %vm439_vm1, %v2502_v30, %v2308_v28  ;;  %v4668_v28 = vld [vmem:[#allocation8_spill] sm:$0xff] }
 0x438   : > { %v2310_v21 = vpop.permute.xlu1 %2309 }
 0x439   : > { %v4328_v33 = vsel %vm439_vm1, %v2503_v63, %v2310_v21 }
 0x43a   : > { %v4330_v57 = vpop.permute.xlu0 %2175 }
 0x43c   : > { %v4332_v35 = vpop.permute.xlu1 %2177 }
 0x43e   : > { %v4334_v29 = vpop.permute.xlu0 %2303 }
 0x440   : > { %v4336_v12 = vpop.permute.xlu1 %2305 }
 0x442   : > { %v2380_v14 = vpop.permute.xlu0 %2379 }
 0x443   : > { %v2539_v7 = vsel %vm2536_vm4, %v4115_v11, %v2380_v14 }
 0x444   : > { %v2571_v40 = vadd.f32 %v4663_v38, %v2539_v7  ;;  %v2382_v44 = vpop.permute.xlu1 %2381 }
 0x445   : > { %v2540_v47 = vsel %vm2536_vm4, %v4120_v9, %v2382_v44  ;;  %v4665_v9 = vld [vmem:[#allocation3_spill] sm:$0xff] }
 0x446   : > { %v2609_v49 = vadd.f32 %v4341_v62, %v2571_v40  ;;  %v2572_v58 = vadd.f32 %v4664_v10, %v2540_v47  ;;  %v2376_v46 = vpop.permute.xlu0 %2375  ;;  %v4669_v40 = vld [vmem:[#allocation7_spill] sm:$0xff] }
 0x447   : > { %v2537_v11 = vsel %vm2536_vm4, %v4131_v4, %v2376_v46 }
 0x448   : > { %v2641_v25 = vmax.f32 %v2609_v49, 0.0  ;;  %v2610_v34 = vadd.f32 %v4341_v62, %v2572_v58  ;;  %v2569_v32 = vadd.f32 %v2537_v11, %v4665_v9  ;;  %v2378_v13 = vpop.permute.xlu1 %2377  ;;  %v4670_v58 = vld [vmem:[#allocation9_spill] sm:$0xff]  ;;  %v4671_v9 = vld [vmem:[#allocation10_spill] sm:$0xff] }
 0x449   : > { %v2538_v2 = vsel %vm2536_vm4, %v4136_v59, %v2378_v13 }
 0x44a   : > { %2674 = vst.msk [vmem:[%s4354_s15 + $0x10] sm:$0xff] %vm2671_vm5, %v2641_v25  ;;  %v2642_v53 = vmax.f32 %v2610_v34, 0.0  ;;  %v2607_v26 = vadd.f32 %v4341_v62, %v2569_v32  ;;  %v2570_v20 = vadd.f32 %v2538_v2, %v4666_v17  ;;  %v2388_v3 = vpop.permute.xlu0 %2387 }
 0x44b   : > { %v2543_v4 = vsel %vm2536_vm4, %v4149_v36, %v2388_v3 }
 0x44c   : > { %2675 = vst.msk [vmem:[%s4354_s15 + $0x18] sm:$0xff] %vm2671_vm5, %v2642_v53  ;;  %v2639_v0 = vmax.f32 %v2607_v26, 0.0  ;;  %v2608_v1 = vadd.f32 %v4341_v62, %v2570_v20  ;;  %v2575_v59 = vadd.f32 %v4667_v60, %v2543_v4  ;;  %v2390_v30 = vpop.permute.xlu1 %2389  ;;  %v4672_v26 = vld [vmem:[#allocation12_spill] sm:$0xff] }
 0x44d   : > { %v2544_v27 = vsel %vm2536_vm4, %v4154_v15, %v2390_v30 }
 0x44e   : > { %2672 = vst.msk [vmem:[%s4354_s15] sm:$0xff] %vm2671_vm5, %v2639_v0  ;;  %v2640_v8 = vmax.f32 %v2608_v1, 0.0  ;;  %v2613_v63 = vadd.f32 %v4341_v62, %v2575_v59  ;;  %v2576_v36 = vadd.f32 %v4668_v28, %v2544_v27  ;;  %v2384_v21 = vpop.permute.xlu0 %2383  ;;  %v4673_v0 = vld [vmem:[#allocation11_spill] sm:$0xff]  ;;  %v4674_v27 = vld [vmem:[#allocation13_spill] sm:$0xff] }
 0x44f   : > { %v2541_v14 = vsel %vm2536_vm4, %v4167_v39, %v2384_v21  ;;  %v4675_v21 = vld [vmem:[#allocation14_spill] sm:$0xff] }
 0x450   : > { %2673 = vst.msk [vmem:[%s4354_s15 + $0x8] sm:$0xff] %vm2671_vm5, %v2640_v8  ;;  %v2645_v7 = vmax.f32 %v2613_v63, 0.0  ;;  %v2614_v38 = vadd.f32 %v4341_v62, %v2576_v36  ;;  %v2573_v15 = vadd.f32 %v2541_v14, %v4669_v40  ;;  %v2386_v44 = vpop.permute.xlu1 %2385 }
 0x451   : > { %v2542_v47 = vsel %vm2536_vm4, %v4172_v42, %v2386_v44 }
 0x452   : > { %2678 = vst.msk [vmem:[%s4354_s15 + $0x30] sm:$0xff] %vm2671_vm5, %v2645_v7  ;;  %v2646_v49 = vmax.f32 %v2614_v38, 0.0  ;;  %v2611_v10 = vadd.f32 %v4341_v62, %v2573_v15  ;;  %v2574_v39 = vadd.f32 %v2542_v47, %v4670_v58  ;;  %v2396_v46 = vpop.permute.xlu0 %2395  ;;  %v4676_v15 = vld [vmem:[#allocation16_spill] sm:$0xff]  ;;  %v4677_v58 = vld [vmem:[#allocation15_spill] sm:$0xff] }
 0x453   : > { %v2547_v11 = vsel %vm2536_vm4, %v4185_v24, %v2396_v46 }
 0x454   : > { %2679 = vst.msk [vmem:[%s4354_s15 + $0x38] sm:$0xff] %vm2671_vm5, %v2646_v49  ;;  %v2643_v25 = vmax.f32 %v2611_v10, 0.0  ;;  %v2612_v34 = vadd.f32 %v4341_v62, %v2574_v39  ;;  %v2579_v42 = vadd.f32 %v4671_v9, %v2547_v11  ;;  %v2398_v32 = vpop.permute.xlu1 %2397 }
 0x455   : > { %v2548_v13 = vsel %vm2536_vm4, %v4190_v56, %v2398_v32 }
 0x456   : > { %2676 = vst.msk [vmem:[%s4354_s15 + $0x20] sm:$0xff] %vm2671_vm5, %v2643_v25  ;;  %v2644_v2 = vmax.f32 %v2612_v34, 0.0  ;;  %v2617_v53 = vadd.f32 %v4341_v62, %v2579_v42  ;;  %v2580_v24 = vadd.f32 %v4672_v26, %v2548_v13  ;;  %v2392_v17 = vpop.permute.xlu0 %2391  ;;  %v4678_v34 = vld [vmem:[#allocation17_spill] sm:$0xff] }
 0x457   : > { %v2545_v20 = vsel %vm2536_vm4, %v4203_v37, %v2392_v17 }
 0x458   : > { %2677 = vst.msk [vmem:[%s4354_s15 + $0x28] sm:$0xff] %vm2671_vm5, %v2644_v2  ;;  %v2649_v3 = vmax.f32 %v2617_v53, 0.0  ;;  %v2618_v4 = vadd.f32 %v4341_v62, %v2580_v24  ;;  %v2577_v56 = vadd.f32 %v2545_v20, %v4673_v0  ;;  %v2394_v1 = vpop.permute.xlu1 %2393  ;;  %v4679_v2 = vld [vmem:[#allocation18_spill] sm:$0xff]  ;;  %v4680_v20 = vld [vmem:[#allocation20_spill] sm:$0xff] }
 0x459   : > { %v2546_v60 = vsel %vm2536_vm4, %v4208_v55, %v2394_v1  ;;  %v4681_v1 = vld [vmem:[#allocation19_spill] sm:$0xff] }
 0x45a   : > { %2682 = vst.msk [vmem:[%s4354_s15 + $0x50] sm:$0xff] %vm2671_vm5, %v2649_v3  ;;  %v2650_v59 = vmax.f32 %v2618_v4, 0.0  ;;  %v2615_v30 = vadd.f32 %v4341_v62, %v2577_v56  ;;  %v2578_v37 = vadd.f32 %v2546_v60, %v4674_v27  ;;  %v2404_v8 = vpop.permute.xlu0 %2403 }
 0x45b   : > { %v2551_v63 = vsel %vm2536_vm4, %v4221_v31, %v2404_v8 }
 0x45c   : > { %2683 = vst.msk [vmem:[%s4354_s15 + $0x58] sm:$0xff] %vm2671_vm5, %v2650_v59  ;;  %v2647_v28 = vmax.f32 %v2615_v30, 0.0  ;;  %v2616_v36 = vadd.f32 %v4341_v62, %v2578_v37  ;;  %v2583_v55 = vadd.f32 %v4675_v21, %v2551_v63  ;;  %v2406_v14 = vpop.permute.xlu1 %2405  ;;  %v4682_v37 = vld [vmem:[#allocation21_spill] sm:$0xff]  ;;  %v4683_v21 = vld [vmem:[#allocation22_spill] sm:$0xff] }
 0x45d   : > { %v2552_v7 = vsel %vm2536_vm4, %v4226_v16, %v2406_v14 }
 0x45e   : > { %2680 = vst.msk [vmem:[%s4354_s15 + $0x40] sm:$0xff] %vm2671_vm5, %v2647_v28  ;;  %v2648_v38 = vmax.f32 %v2616_v36, 0.0  ;;  %v2621_v40 = vadd.f32 %v4341_v62, %v2583_v55  ;;  %v2584_v31 = vadd.f32 %v4676_v15, %v2552_v7  ;;  %v2400_v44 = vpop.permute.xlu0 %2399 }
 0x45f   : > { %v2549_v47 = vsel %vm2536_vm4, %v4239_v5, %v2400_v44 }
 0x460   : > { %2681 = vst.msk [vmem:[%s4354_s15 + $0x48] sm:$0xff] %vm2671_vm5, %v2648_v38  ;;  %v2653_v49 = vmax.f32 %v2621_v40, 0.0  ;;  %v2622_v10 = vadd.f32 %v4341_v62, %v2584_v31  ;;  %v2581_v16 = vadd.f32 %v2549_v47, %v4677_v58  ;;  %v2402_v39 = vpop.permute.xlu1 %2401  ;;  %v4684_v40 = vld [vmem:[#allocation24_spill] sm:$0xff] }
 0x461   : > { %v2550_v46 = vsel %vm2536_vm4, %v4244_v22, %v2402_v39 }
 0x462   : > { %2686 = vst.msk [vmem:[%s4354_s15 + $0x70] sm:$0xff] %vm2671_vm5, %v2653_v49  ;;  %v2654_v11 = vmax.f32 %v2622_v10, 0.0  ;;  %v2619_v25 = vadd.f32 %v4341_v62, %v2581_v16  ;;  %v2582_v5 = vadd.f32 %v2550_v46, %v4678_v34  ;;  %v2412_v9 = vpop.permute.xlu0 %2411  ;;  %v4685_v49 = vld [vmem:[#allocation23_spill] sm:$0xff]  ;;  %v4686_v46 = vld [vmem:[#allocation25_spill] sm:$0xff] }
 0x463   : > { %v2555_v42 = vsel %vm2536_vm4, %v4257_v50, %v2412_v9  ;;  %v4687_v9 = vld [vmem:[#allocation26_spill] sm:$0xff] }
 0x464   : > { %2687 = vst.msk [vmem:[%s4354_s15 + $0x78] sm:$0xff] %vm2671_vm5, %v2654_v11  ;;  %v2651_v32 = vmax.f32 %v2619_v25, 0.0  ;;  %v2620_v13 = vadd.f32 %v4341_v62, %v2582_v5  ;;  %v2587_v22 = vadd.f32 %v4679_v2, %v2555_v42  ;;  %v2414_v53 = vpop.permute.xlu1 %2413 }
 0x465   : > { %v2556_v26 = vsel %vm2536_vm4, %v4262_v23, %v2414_v53 }
 0x466   : > { %2684 = vst.msk [vmem:[%s4354_s15 + $0x60] sm:$0xff] %vm2671_vm5, %v2651_v32  ;;  %v2652_v24 = vmax.f32 %v2620_v13, 0.0  ;;  %v2625_v17 = vadd.f32 %v4341_v62, %v2587_v22  ;;  %v2588_v50 = vadd.f32 %v4680_v20, %v2556_v26  ;;  %v2408_v3 = vpop.permute.xlu0 %2407  ;;  %v4688_v22 = vld [vmem:[#allocation28_spill] sm:$0xff]  ;;  %v4689_v20 = vld [vmem:[#allocation27_spill] sm:$0xff] }
 0x467   : > { %v2553_v4 = vsel %vm2536_vm4, %v4275_v61, %v2408_v3  ;;  %v4690_v3 = vld [vmem:[#allocation53_spill] sm:$0xff] }
 0x468   : > { %2685 = vst.msk [vmem:[%s4354_s15 + $0x68] sm:$0xff] %vm2671_vm5, %v2652_v24  ;;  %v2657_v0 = vmax.f32 %v2625_v17, 0.0  ;;  %v2626_v56 = vadd.f32 %v4341_v62, %v2588_v50  ;;  %v2585_v23 = vadd.f32 %v2553_v4, %v4681_v1  ;;  %v2410_v60 = vpop.permute.xlu1 %2409  ;;  %v2500_v4 = vsel %vm2471_vm3, %v4690_v3, %v4330_v57 }
 0x469   : > { %v2554_v59 = vsel %vm2536_vm4, %v4278_v51, %v2410_v60 }
 0x46a   : > { %2690 = vst.msk [vmem:[%s4354_s15 + $0x90] sm:$0xff] %vm2671_vm5, %v2657_v0  ;;  %v2658_v30 = vmax.f32 %v2626_v56, 0.0  ;;  %v2623_v27 = vadd.f32 %v4341_v62, %v2585_v23  ;;  %v2586_v61 = vadd.f32 %v2554_v59, %v4682_v37  ;;  %v2420_v8 = vpop.permute.xlu0 %2419  ;;  %v4691_v23 = vld [vmem:[#allocation29_spill] sm:$0xff] }
 0x46b   : > { %v2559_v63 = vsel %vm2536_vm4, %v4285_v54, %v2420_v8 }
 0x46c   : > { %2691 = vst.msk [vmem:[%s4354_s15 + $0x98] sm:$0xff] %vm2671_vm5, %v2658_v30  ;;  %v2655_v28 = vmax.f32 %v2623_v27, 0.0  ;;  %v2624_v36 = vadd.f32 %v4341_v62, %v2586_v61  ;;  %v2591_v51 = vadd.f32 %v4683_v21, %v2559_v63  ;;  %v2422_v55 = vpop.permute.xlu1 %2421  ;;  %v4692_v30 = vld [vmem:[#allocation55_spill] sm:$0xff]  ;;  %v4694_v21 = vld [vmem:[#allocation33_spill] sm:$0xff] }
 0x46d   : > { %v2560_v14 = vsel %vm2536_vm4, %v4288_v18, %v2422_v55  ;;  %v2501_v57 = vsel %vm2471_vm3, %v4692_v30, %v4332_v35  ;;  %v4693_v61 = vld [vmem:[#allocation31_spill] sm:$0xff] }
 0x46e   : > { %2688 = vst.msk [vmem:[%s4354_s15 + $0x80] sm:$0xff] %vm2671_vm5, %v2655_v28  ;;  %v2656_v7 = vmax.f32 %v2624_v36, 0.0  ;;  %v2629_v38 = vadd.f32 %v4341_v62, %v2591_v51  ;;  %v2592_v54 = vadd.f32 %v4684_v40, %v2560_v14  ;;  %v2416_v15 = vpop.permute.xlu0 %2415 }
 0x46f   : > { %v2557_v31 = vsel %vm2536_vm4, %v4295_v41, %v2416_v15 }
 0x470   : > { %2689 = vst.msk [vmem:[%s4354_s15 + $0x88] sm:$0xff] %vm2671_vm5, %v2656_v7  ;;  %v2661_v44 = vmax.f32 %v2629_v38, 0.0  ;;  %v2630_v47 = vadd.f32 %v4341_v62, %v2592_v54  ;;  %v2589_v18 = vadd.f32 %v2557_v31, %v4685_v49  ;;  %v2418_v10 = vpop.permute.xlu1 %2417  ;;  %v4695_v38 = vld [vmem:[#allocation30_spill] sm:$0xff] }
 0x471   : > { %v2558_v58 = vsel %vm2536_vm4, %v4298_v45, %v2418_v10 }
 0x472   : > { %2694 = vst.msk [vmem:[%s4354_s15 + $0xb0] sm:$0xff] %vm2671_vm5, %v2661_v44  ;;  %v2662_v16 = vmax.f32 %v2630_v47, 0.0  ;;  %v2627_v39 = vadd.f32 %v4341_v62, %v2589_v18  ;;  %v2590_v41 = vadd.f32 %v2558_v58, %v4686_v46  ;;  %v2428_v11 = vpop.permute.xlu0 %2427  ;;  %v4696_v47 = vld [vmem:[#allocation32_spill] sm:$0xff] }
 0x473   : > { %v2563_v25 = vsel %vm2536_vm4, %v4305_v43, %v2428_v11 }
 0x474   : > { %2695 = vst.msk [vmem:[%s4354_s15 + $0xb8] sm:$0xff] %vm2671_vm5, %v2662_v16  ;;  %v2659_v34 = vmax.f32 %v2627_v39, 0.0  ;;  %v2628_v5 = vadd.f32 %v4341_v62, %v2590_v41  ;;  %v2595_v42 = vadd.f32 %v4687_v9, %v2563_v25  ;;  %v2430_v45 = vpop.permute.xlu1 %2429 }
 0x475   : > { %v2564_v32 = vsel %vm2536_vm4, %v4308_v48, %v2430_v45 }
 0x476   : > { %2692 = vst.msk [vmem:[%s4354_s15 + $0xa0] sm:$0xff] %vm2671_vm5, %v2659_v34  ;;  %v2660_v13 = vmax.f32 %v2628_v5, 0.0  ;;  %v2633_v2 = vadd.f32 %v4341_v62, %v2595_v42  ;;  %v2596_v53 = vadd.f32 %v4688_v22, %v2564_v32  ;;  %v2424_v43 = vpop.permute.xlu0 %2423 }
 0x477   : > { %v2561_v26 = vsel %vm2536_vm4, %v4315_v52, %v2424_v43  ;;  %v2532_v52 = vsel %vm439_vm1, %v2500_v4, %v4334_v29 }
 0x478   : > { %2693 = vst.msk [vmem:[%s4354_s15 + $0xa8] sm:$0xff] %vm2671_vm5, %v2660_v13  ;;  %v2665_v24 = vmax.f32 %v2633_v2, 0.0  ;;  %v2634_v17 = vadd.f32 %v4341_v62, %v2596_v53  ;;  %v2593_v50 = vadd.f32 %v2561_v26, %v4689_v20  ;;  %v2426_v48 = vpop.permute.xlu1 %2425 }
 0x479   : > { %v2562_v0 = vsel %vm2536_vm4, %v4318_v6, %v2426_v48  ;;  %v2533_v6 = vsel %vm439_vm1, %v2501_v57, %v4336_v12 }
 0x47a   : > { %2698 = vst.msk [vmem:[%s4354_s15 + $0xd0] sm:$0xff] %vm2671_vm5, %v2665_v24  ;;  %v2666_v56 = vmax.f32 %v2634_v17, 0.0  ;;  %v2631_v1 = vadd.f32 %v4341_v62, %v2593_v50  ;;  %v2594_v60 = vadd.f32 %v2562_v0, %v4691_v23  ;;  %v2432_v59 = vpop.permute.xlu0 %2431 }
 0x47b   : > { %v2565_v27 = vsel %vm2536_vm4, %v2532_v52, %v2432_v59 }
 0x47c   : > { %2699 = vst.msk [vmem:[%s4354_s15 + $0xd8] sm:$0xff] %vm2671_vm5, %v2666_v56  ;;  %v2663_v29 = vmax.f32 %v2631_v1, 0.0  ;;  %v2632_v37 = vadd.f32 %v4341_v62, %v2594_v60  ;;  %v2597_v8 = vadd.f32 %v2565_v27, %v4693_v61  ;;  %v2434_v63 = vpop.permute.xlu1 %2433 }
 0x47d   : > { %v2566_v28 = vsel %vm2536_vm4, %v2533_v6, %v2434_v63 }
 0x47e   : > { %2696 = vst.msk [vmem:[%s4354_s15 + $0xc0] sm:$0xff] %vm2671_vm5, %v2663_v29  ;;  %v2664_v35 = vmax.f32 %v2632_v37, 0.0  ;;  %v2635_v36 = vadd.f32 %v4341_v62, %v2597_v8  ;;  %v2598_v51 = vadd.f32 %v2566_v28, %v4694_v21  ;;  %v2436_v12 = vpop.permute.xlu0 %2435 }
 0x47f   : > { %v2567_v55 = vsel %vm2536_vm4, %v4325_v19, %v2436_v12 }
 0x480   : > { %2697 = vst.msk [vmem:[%s4354_s15 + $0xc8] sm:$0xff] %vm2671_vm5, %v2664_v35  ;;  %v2667_v14 = vmax.f32 %v2635_v36, 0.0  ;;  %v2636_v7 = vadd.f32 %v4341_v62, %v2598_v51  ;;  %v2599_v40 = vadd.f32 %v4695_v38, %v2567_v55  ;;  %v2438_v54 = vpop.permute.xlu1 %2437 }
 0x481   : > { %v2568_v15 = vsel %vm2536_vm4, %v4328_v33, %v2438_v54 }
 0x482   : > { %2700 = vst.msk [vmem:[%s4354_s15 + $0xe0] sm:$0xff] %vm2671_vm5, %v2667_v14  ;;  %v2668_v31 = vmax.f32 %v2636_v7, 0.0  ;;  %v2637_v44 = vadd.f32 %v4341_v62, %v2599_v40  ;;  %v2600_v49 = vadd.f32 %v4696_v47, %v2568_v15 }
 0x484   : > { %2701 = vst.msk [vmem:[%s4354_s15 + $0xe8] sm:$0xff] %vm2671_vm5, %v2668_v31  ;;  %v2669_v19 = vmax.f32 %v2637_v44, 0.0  ;;  %v2638_v18 = vadd.f32 %v4341_v62, %v2600_v49 }
 0x486   : > { %2702 = vst.msk [vmem:[%s4354_s15 + $0xf0] sm:$0xff] %vm2671_vm5, %v2669_v19  ;;  %v2670_v10 = vmax.f32 %v2638_v18, 0.0 }
 0x488   : > { %2703 = vst.msk [vmem:[%s4354_s15 + $0xf8] sm:$0xff] %vm2671_vm5, %v2670_v10 }
 0x489 PF: > { %s18_s27 = sadd.s32 1, %s3306_s27  }
 0x48a   : > { %p15_p4 = scmp.ge.s32.totalorder %s18_s27, 4  }
 0x48c   :  { %17 = sbr.rel (!%p15_p4) target bundleno = 1 (0x1), region = 82 }

</bundles_post_ra>
